<compile_context>
chip_gen: v6e
topology: v6e:2x2x1
jax: 0.10.0
libtpu: 0.0.40
codegen_flags: <defaults>
</compile_context>

<pallas_src>
import jax
import jax.numpy as jnp
from jax.experimental import pallas as pl
from jax.experimental.pallas import tpu as pltpu

# ---- synthetic (small) config ----
B = 2            # batch
S = 8            # args.user_log_length
H = 32           # args.news_dim == ffconfig.hidden_size
NH = 2           # num_attention_heads
HD = H // NH     # attention_head_size
INTER = 64       # intermediate_size
ATT_H = H // 2   # AttentionPooling fc1 output (hidden_size // 2)
LN_EPS = 1e-12

MAX_TB = 256     # users per grid step, upper cap (VMEM budget for v7x's 64 MiB; raise to
                 # 512 on v5e/v6e's 128 MiB). Actual TB adapts to the batch, see _choose_tb.
MATMUL_DTYPE = jnp.bfloat16   # MXU operands; accumulation stays f32 via preferred_element_type.
EUP_BF16 = False              # set True on v6e/v7x if a bundle dump shows the EUP slot
                              # saturating (exp/tanh in bf16); keep False on v5e.

# ---- row layout of the packed (VROWS, VWIDTH) bias / LayerNorm / pos-emb tensor ----
R_BFUSED  = S        # [bq | bk | scale*((bq@wqa + bqa)@E) | bq@wso]   width 4H
R_BKA     = S + 1    # scale * (bka @ E)                               width H
R_LN_E_G  = S + 2
R_LN_E_B  = S + 3
R_BSO     = S + 4    # bt @ wso + bso (BertSelfOutput bias, transform bias folded in)
R_LN_SO_G = S + 5
R_LN_SO_B = S + 6
R_BI      = S + 7    # width INTER
R_BO      = S + 8
R_LN_O_G  = S + 9
R_LN_O_B  = S + 10
R_BP1     = S + 11   # width ATT_H
R_BP2     = S + 12   # scalar at column 0
R_WP2     = S + 13   # wp2^T, width ATT_H
VROWS     = S + 14
VWIDTH    = max(4 * H, INTER, H, ATT_H)


def _round_up(x, m):
    return ((x + m - 1) // m) * m


def _choose_tb(b):
    """Users per grid step: multiple of 8, capped at MAX_TB, and (when the batch allows)
    split so the grid has >= 2 tiles and both v7x TensorCores get work."""
    bp = _round_up(b, 8)
    if bp <= 8:
        return 8                                    # toy batches (the demo)
    half = _round_up((bp + 1) // 2, 8)
    return max(8, min(MAX_TB, half))


def _exp(x):
    if EUP_BF16:
        return jnp.exp(x.astype(jnp.bfloat16)).astype(jnp.float32)
    return jnp.exp(x)


def _tanh(x):
    if EUP_BF16:
        return jnp.tanh(x.astype(jnp.bfloat16)).astype(jnp.float32)
    return jnp.tanh(x)


def _layer_norm(x, g, b):
    mu = jnp.mean(x, axis=-1, keepdims=True)
    var = jnp.mean(jnp.square(x - mu), axis=-1, keepdims=True)
    return (x - mu) * jax.lax.rsqrt(var + LN_EPS) * g + b


def _gelu(x):
    # TODO(synk): tanh approximation of GELU (HF "gelu_new"); exact-erf GELU differs slightly.
    return 0.5 * x * (1.0 + _tanh(0.7978845608028654 * (x + 0.044715 * x * x * x)))


def _softmax_over_seq(scores):
    # softmax over the user-log sequence axis (axis=1 of a (TB, S, X) array)
    m = jnp.max(scores, axis=1, keepdims=True)
    e = _exp(scores - m)
    return e * pl.reciprocal(jnp.sum(e, axis=1, keepdims=True), approx=True)


def _mm(x, w):
    # MXU matmul: bf16 operands, f32 accumulation.
    return jnp.dot(x.astype(w.dtype), w, preferred_element_type=jnp.float32)


def user_encoder_kernel(x_ref, mask_ref, wqk_ref, whh_ref, wi_ref, wo_ref,
                        wp1_ref, vec_ref, out_ref):
    tb = x_ref.shape[0]
    x = x_ref[...]                                  # (TB, S, H)   f32
    mask2 = mask_ref[...]                           # (TB*S, 1)    1.0 = real news, 0.0 = pad
    ext2 = (1.0 - mask2) * -10000.0                 # additive attention mask, (TB*S, 1)

    # packed rows (biases / LayerNorm params / position embeddings)
    pos      = vec_ref[0:S, :H]                                   # (S, H)
    b_fused  = vec_ref[R_BFUSED:R_BFUSED + 1, :4 * H]
    bka_full = vec_ref[R_BKA:R_BKA + 1, :H]
    ln_e_g   = vec_ref[R_LN_E_G:R_LN_E_G + 1, :H]
    ln_e_b   = vec_ref[R_LN_E_B:R_LN_E_B + 1, :H]
    b_so     = vec_ref[R_BSO:R_BSO + 1, :H]
    ln_so_g  = vec_ref[R_LN_SO_G:R_LN_SO_G + 1, :H]
    ln_so_b  = vec_ref[R_LN_SO_B:R_LN_SO_B + 1, :H]
    bi       = vec_ref[R_BI:R_BI + 1, :INTER]
    bo       = vec_ref[R_BO:R_BO + 1, :H]
    ln_o_g   = vec_ref[R_LN_O_G:R_LN_O_G + 1, :H]
    ln_o_b   = vec_ref[R_LN_O_B:R_LN_O_B + 1, :H]
    bp1      = vec_ref[R_BP1:R_BP1 + 1, :ATT_H]
    bp2      = vec_ref[R_BP2:R_BP2 + 1, 0:1]
    wp2_row  = vec_ref[R_WP2:R_WP2 + 1, :ATT_H]

    # --- Fastformer embedding stage: position embeddings + LayerNorm (dropout = identity)
    h3 = _layer_norm(x + pos[None, :, :], ln_e_g, ln_e_b)         # (TB, S, H)
    h2 = h3.reshape(tb * S, H)

    # --- FastSelfAttention: fused, lane-dense (TB*S, 4H=128) projection:
    #     [query | key | pre-scaled lane-expanded query-att score | query @ wso]
    fused = _mm(h2, wqk_ref[...]) + b_fused                       # (TB*S, 4H)
    mq2   = fused[:, 0 * H:1 * H]                                 # mixed query
    mk2   = fused[:, 1 * H:2 * H]                                 # mixed key
    q_raw = fused[:, 2 * H:3 * H]                                 # head score (scale folded in)
    mq_so = fused[:, 3 * H:4 * H]                                 # mq2 @ wso (pre-projected residual)

    mq3 = mq2.reshape(tb, S, H)
    mk3 = mk2.reshape(tb, S, H)

    q_w = _softmax_over_seq((q_raw + ext2).reshape(tb, S, H))     # (TB, S, H)
    pooled_q = jnp.sum(q_w * mq3, axis=1, keepdims=True)          # (TB, 1, H)
    mqk3 = mk3 * pooled_q                                         # (TB, S, H)
    mqk2 = mqk3.reshape(tb * S, H)

    # key attention score, pre-expanded per head lane and pre-scaled (scale folded in)
    k_raw = _mm(mqk2, whh_ref[0]) + bka_full                      # (TB*S, H)
    k_w = _softmax_over_seq((k_raw + ext2).reshape(tb, S, H))     # (TB, S, H)
    pooled_k = jnp.sum(k_w * mqk3, axis=1, keepdims=True)         # (TB, 1, H)

    weighted_value = (pooled_k * mq3).reshape(tb * S, H)
    # transform + BertSelfOutput dense folded into ONE MXU pass:
    #   so = (wv @ wt + bt + mq) @ wso + bso = wv @ (wt@wso) + (bt@wso + bso) + mq@wso
    so = _mm(weighted_value, whh_ref[1]) + b_so + mq_so
    attn_out = _layer_norm(so + h2, ln_so_g, ln_so_b)             # (TB*S, H)

    # --- Feed-forward: intermediate (GELU) + output dense + residual + LayerNorm
    inter = _gelu(_mm(attn_out, wi_ref[...]) + bi)
    ffn = _mm(inter, wo_ref[...]) + bo
    hidden = _layer_norm(ffn + attn_out, ln_o_g, ln_o_b)          # (TB*S, H)

    # --- masked AttentionPooling over the log sequence (Fastformer pooler) ---
    e = _tanh(_mm(hidden, wp1_ref[...]) + bp1)                    # (TB*S, ATT_H)
    # ATT_H -> 1 projection as VPU multiply + lane-reduce (no 1-lane-wide matmul)
    alpha2 = _exp(jnp.sum(e * wp2_row, axis=-1, keepdims=True) + bp2) * mask2   # (TB*S, 1)
    alpha3 = alpha2.reshape(tb, S, 1)
    denom = jnp.sum(alpha3, axis=1, keepdims=True) + 1e-8
    alpha3 = alpha3 * pl.reciprocal(denom, approx=True)
    out_ref[...] = jnp.sum(hidden.reshape(tb, S, H) * alpha3, axis=1)   # (TB, H)


PARAM_ORDER = [
    "pos_emb", "ln_e_g", "ln_e_b",
    "wq", "bq", "wk", "bk", "wqa", "bqa", "wka", "bka", "wt", "bt",
    "wso", "bso", "ln_so_g", "ln_so_b",
    "wi", "bi", "wo", "bo", "ln_o_g", "ln_o_b",
    "wp1", "bp1", "wp2", "bp2",
]

PARAM_SHAPES = {
    "pos_emb": (S, H),
    "ln_e_g": (1, H), "ln_e_b": (1, H),
    "wq": (H, H), "bq": (1, H),
    "wk": (H, H), "bk": (1, H),
    "wqa": (H, NH), "bqa": (1, NH),
    "wka": (H, NH), "bka": (1, NH),
    "wt": (H, H), "bt": (1, H),
    "wso": (H, H), "bso": (1, H),
    "ln_so_g": (1, H), "ln_so_b": (1, H),
    "wi": (H, INTER), "bi": (1, INTER),
    "wo": (INTER, H), "bo": (1, H),
    "ln_o_g": (1, H), "ln_o_b": (1, H),
    "wp1": (H, ATT_H), "bp1": (1, ATT_H),
    "wp2": (ATT_H, 1), "bp2": (1, 1),
}


def init_params(key):
    params = {}
    keys = jax.random.split(key, len(PARAM_ORDER))
    for k, name in zip(keys, PARAM_ORDER):
        shape = PARAM_SHAPES[name]
        if name.startswith("ln_") and name.endswith("_g"):
            params[name] = jnp.ones(shape, jnp.float32)
        elif name.startswith("ln_") and name.endswith("_b"):
            params[name] = jnp.zeros(shape, jnp.float32)
        else:
            params[name] = jax.random.uniform(k, shape, jnp.float32, -0.1, 0.1)
    return params


def pack_params(params):
    """Fold / pack the 27 torch-style tensors into 6 kernel inputs.

    Called ONCE at init / param-update time (hoisted out of the jitted forward).
    All weight compositions (wq@wso, wt@wso, scale folding) are done in f32, then cast.
    """
    f32 = jnp.float32
    scale = 1.0 / (HD ** 0.5)
    # head-lane expander E[n, h] = 1.0 iff lane h belongs to head n
    expand = (jnp.arange(NH, dtype=jnp.int32)[:, None]
              == (jnp.arange(H, dtype=jnp.int32) // HD)[None, :]).astype(f32)   # (NH, H)

    wq, wk = params["wq"].astype(f32), params["wk"].astype(f32)
    bq, bk = params["bq"].astype(f32), params["bk"].astype(f32)
    wt, bt = params["wt"].astype(f32), params["bt"].astype(f32)
    wso, bso = params["wso"].astype(f32), params["bso"].astype(f32)

    # fold the narrow query-attention projection AND the 1/sqrt(HD) scale into the fused matmul:
    #   q_score_full = h @ (scale * wq @ wqa @ E) + scale * (bq @ wqa + bqa) @ E
    w_qs_full = (wq @ params["wqa"]) @ expand * scale               # (H, H)
    b_qs_full = (bq @ params["wqa"] + params["bqa"]) @ expand * scale   # (1, H)
    # fold wso applied to the mixed-query residual into a 4th fused column block
    w_q_so = wq @ wso                                               # (H, H)
    b_q_so = bq @ wso                                               # (1, H)
    w_fused = jnp.concatenate([wq, wk, w_qs_full, w_q_so], axis=1).astype(MATMUL_DTYPE)  # (H, 4H)
    b_fused = jnp.concatenate([bq, bk, b_qs_full, b_q_so], axis=1).astype(f32)           # (1, 4H)

    # key-attention score weights, lane-expanded and pre-scaled
    wka_full = ((params["wka"] @ expand) * scale).astype(f32)       # (H, H)
    bka_full = ((params["bka"] @ expand) * scale).astype(f32)       # (1, H)

    # transform + BertSelfOutput dense composed into one matrix (f32, then bf16)
    w_t_so = wt @ wso                                               # (H, H)
    b_so = bt @ wso + bso                                           # (1, H)

    w_hh = jnp.stack([wka_full, w_t_so], axis=0).astype(MATMUL_DTYPE)   # (2, H, H)
    w_i = params["wi"].astype(MATMUL_DTYPE)
    w_o = params["wo"].astype(MATMUL_DTYPE)
    w_p1 = params["wp1"].astype(MATMUL_DTYPE)

    def row(v):
        v = v.astype(f32)
        return jnp.pad(v, ((0, 0), (0, VWIDTH - v.shape[1])))

    rows = [
        jnp.pad(params["pos_emb"].astype(f32), ((0, 0), (0, VWIDTH - H))),
        row(b_fused), row(bka_full),
        row(params["ln_e_g"]), row(params["ln_e_b"]),
        row(b_so),
        row(params["ln_so_g"]), row(params["ln_so_b"]),
        row(params["bi"]), row(params["bo"]),
        row(params["ln_o_g"]), row(params["ln_o_b"]),
        row(params["bp1"]), row(params["bp2"]),
        row(params["wp2"].T),
    ]
    vec_pack = jnp.concatenate(rows, axis=0)                        # (VROWS, VWIDTH) f32
    return (w_fused, w_hh, w_i, w_o, w_p1, vec_pack)


@jax.jit
def user_encoder_forward(user_news_vecs, log_mask, packed_weights):
    b, s, h = user_news_vecs.shape
    assert (s, h) == (S, H)
    weights = tuple(packed_weights)

    tb = _choose_tb(b)
    n_tiles = pl.cdiv(b, tb)
    bp = n_tiles * tb

    x = user_news_vecs.astype(jnp.float32)
    mask = log_mask.astype(jnp.float32)
    if bp != b:
        # pad the batch to whole tb-user tiles; a fully padded user yields an all-zero
        # user vector (the log_mask kills the pooler weights), never NaN/inf.
        x = jnp.pad(x, ((0, bp - b), (0, 0), (0, 0)))
        mask = jnp.pad(mask, ((0, bp - b), (0, 0)))
    mask_flat = mask.reshape(bp * S, 1)

    def _weight_spec(w):
        # constant index_map -> block is resident across grid steps.
        # (single-buffering via pl.Buffered(1) skipped: all weights total ~32 KiB.)
        return pl.BlockSpec(w.shape, lambda i, _nd=w.ndim: (0,) * _nd)

    in_specs = [
        pl.BlockSpec((tb, S, H), lambda i: (i, 0, 0)),     # tb users' clicked-news vectors
        pl.BlockSpec((tb * S, 1), lambda i: (i, 0)),       # their flattened log_mask
    ] + [_weight_spec(w) for w in weights]

    # Explicit VMEM budget: ~24 live lane-padded (tb*S, 128) f32 temporaries plus
    # double-buffered x blocks and weights/slack; clamp to v7x's 64 MiB physical VMEM.
    slab = tb * S * 128 * 4
    vmem_limit = min(max(24 * slab + 4 * tb * S * H * 4 + (1 << 20), 32 << 20), 64 << 20)

    out = pl.pallas_call(
        user_encoder_kernel,
        out_shape=jax.ShapeDtypeStruct((bp, H), jnp.float32),
        grid_spec=pltpu.PrefetchScalarGridSpec(
            num_scalar_prefetch=0,
            grid=(n_tiles,),
            in_specs=in_specs,
            out_specs=pl.BlockSpec((tb, H), lambda i: (i, 0)),
        ),
        compiler_params=pltpu.CompilerParams(
            dimension_semantics=("parallel",),
            vmem_limit_bytes=vmem_limit,
        ),
    )(x, mask_flat, *weights)
    return out[:b]


if __name__ == "__main__":
    key = jax.random.PRNGKey(0)
    k_x, k_p = jax.random.split(key)

    user_news_vecs = jax.random.normal(k_x, (B, S, H), jnp.float32)
    # second user has two padded positions at the end of its log
    log_mask = jnp.array([[1.0] * S, [1.0] * (S - 2) + [0.0, 0.0]], jnp.float32)

    params = init_params(k_p)
    packed = pack_params(params)   # pre-pack once, outside the jitted forward
    user_vec = user_encoder_forward(user_news_vecs, log_mask, packed)
    jax.block_until_ready(user_vec)
    assert user_vec.shape == (B, H) and user_vec.dtype == jnp.float32
    assert bool(jnp.all(jnp.isfinite(user_vec)))
    print("KERNEL_OK")
</pallas_src>

<mosaic_0001>
module attributes {stable_mosaic.version = 11 : i64} {
  func.func @user_encoder_kernel(%arg0: i32, %arg1: memref<8x8x32xf32, #tpu.memory_space<vmem>>, %arg2: memref<64x1xf32, #tpu.memory_space<vmem>>, %arg3: memref<32x128xbf16, #tpu.memory_space<vmem>>, %arg4: memref<2x32x32xbf16, #tpu.memory_space<vmem>>, %arg5: memref<32x64xbf16, #tpu.memory_space<vmem>>, %arg6: memref<64x32xbf16, #tpu.memory_space<vmem>>, %arg7: memref<32x16xbf16, #tpu.memory_space<vmem>>, %arg8: memref<22x128xf32, #tpu.memory_space<vmem>>, %arg9: memref<8x32xf32, #tpu.memory_space<vmem>>) attributes {dimension_semantics = [#tpu.dimension_semantics<parallel>], iteration_bounds = array<i64: 1>, scalar_prefetch = 0 : i64, scratch_operands = 0 : i64, tpu.core_type = #tpu.core_type<tc>, window_params = [{transform_indices = @transform_0, window_bounds = array<i64: 8, 8, 32>}, {transform_indices = @transform_1, window_bounds = array<i64: 64, 1>}, {pipeline_mode = #tpu.pipeline_mode<synchronous>, transform_indices = @transform_2, window_bounds = array<i64: 32, 128>}, {pipeline_mode = #tpu.pipeline_mode<synchronous>, transform_indices = @transform_3, window_bounds = array<i64: 2, 32, 32>}, {pipeline_mode = #tpu.pipeline_mode<synchronous>, transform_indices = @transform_4, window_bounds = array<i64: 32, 64>}, {pipeline_mode = #tpu.pipeline_mode<synchronous>, transform_indices = @transform_5, window_bounds = array<i64: 64, 32>}, {pipeline_mode = #tpu.pipeline_mode<synchronous>, transform_indices = @transform_6, window_bounds = array<i64: 32, 16>}, {pipeline_mode = #tpu.pipeline_mode<synchronous>, transform_indices = @transform_7, window_bounds = array<i64: 22, 128>}, {transform_indices = @transform_8, window_bounds = array<i64: 8, 32>}]} {
    %c0 = arith.constant 0 : index
    %c0_0 = arith.constant 0 : index
    %c0_1 = arith.constant 0 : index
    %0 = vector.load %arg1[%c0, %c0_0, %c0_1] : memref<8x8x32xf32, #tpu.memory_space<vmem>>, vector<8x8x32xf32>
    %c0_2 = arith.constant 0 : index
    %c0_3 = arith.constant 0 : index
    %1 = vector.load %arg2[%c0_2, %c0_3] : memref<64x1xf32, #tpu.memory_space<vmem>>, vector<64x1xf32>
    %cst = arith.constant 1.000000e+00 : f32
    %2 = vector.broadcast %cst : f32 to vector<64x1xf32>
    %3 = arith.subf %2, %1 : vector<64x1xf32>
    %cst_4 = arith.constant -1.000000e+04 : f32
    %4 = vector.broadcast %cst_4 : f32 to vector<64x1xf32>
    %5 = arith.mulf %3, %4 : vector<64x1xf32>
    %c0_5 = arith.constant 0 : index
    %c0_6 = arith.constant 0 : index
    %6 = vector.load %arg8[%c0_5, %c0_6] : memref<22x128xf32, #tpu.memory_space<vmem>>, vector<8x32xf32>
    %c8 = arith.constant 8 : index
    %c0_7 = arith.constant 0 : index
    %7 = vector.load %arg8[%c8, %c0_7] : memref<22x128xf32, #tpu.memory_space<vmem>>, vector<1x128xf32>
    %c9 = arith.constant 9 : index
    %c0_8 = arith.constant 0 : index
    %8 = vector.load %arg8[%c9, %c0_8] : memref<22x128xf32, #tpu.memory_space<vmem>>, vector<1x32xf32>
    %c10 = arith.constant 10 : index
    %c0_9 = arith.constant 0 : index
    %9 = vector.load %arg8[%c10, %c0_9] : memref<22x128xf32, #tpu.memory_space<vmem>>, vector<1x32xf32>
    %c11 = arith.constant 11 : index
    %c0_10 = arith.constant 0 : index
    %10 = vector.load %arg8[%c11, %c0_10] : memref<22x128xf32, #tpu.memory_space<vmem>>, vector<1x32xf32>
    %c12 = arith.constant 12 : index
    %c0_11 = arith.constant 0 : index
    %11 = vector.load %arg8[%c12, %c0_11] : memref<22x128xf32, #tpu.memory_space<vmem>>, vector<1x32xf32>
    %c13 = arith.constant 13 : index
    %c0_12 = arith.constant 0 : index
    %12 = vector.load %arg8[%c13, %c0_12] : memref<22x128xf32, #tpu.memory_space<vmem>>, vector<1x32xf32>
    %c14 = arith.constant 14 : index
    %c0_13 = arith.constant 0 : index
    %13 = vector.load %arg8[%c14, %c0_13] : memref<22x128xf32, #tpu.memory_space<vmem>>, vector<1x32xf32>
    %c15 = arith.constant 15 : index
    %c0_14 = arith.constant 0 : index
    %14 = vector.load %arg8[%c15, %c0_14] : memref<22x128xf32, #tpu.memory_space<vmem>>, vector<1x64xf32>
    %c16 = arith.constant 16 : index
    %c0_15 = arith.constant 0 : index
    %15 = vector.load %arg8[%c16, %c0_15] : memref<22x128xf32, #tpu.memory_space<vmem>>, vector<1x32xf32>
    %c17 = arith.constant 17 : index
    %c0_16 = arith.constant 0 : index
    %16 = vector.load %arg8[%c17, %c0_16] : memref<22x128xf32, #tpu.memory_space<vmem>>, vector<1x32xf32>
    %c18 = arith.constant 18 : index
    %c0_17 = arith.constant 0 : index
    %17 = vector.load %arg8[%c18, %c0_17] : memref<22x128xf32, #tpu.memory_space<vmem>>, vector<1x32xf32>
    %c19 = arith.constant 19 : index
    %c0_18 = arith.constant 0 : index
    %18 = vector.load %arg8[%c19, %c0_18] : memref<22x128xf32, #tpu.memory_space<vmem>>, vector<1x16xf32>
    %c20 = arith.constant 20 : index
    %c0_19 = arith.constant 0 : index
    %19 = vector.load %arg8[%c20, %c0_19] : memref<22x128xf32, #tpu.memory_space<vmem>>, vector<1x1xf32>
    %c21 = arith.constant 21 : index
    %c0_20 = arith.constant 0 : index
    %20 = vector.load %arg8[%c21, %c0_20] : memref<22x128xf32, #tpu.memory_space<vmem>>, vector<1x16xf32>
    %21 = vector.shape_cast %6 : vector<8x32xf32> to vector<1x8x32xf32>
    %22 = vector.broadcast %21 : vector<1x8x32xf32> to vector<8x8x32xf32>
    %23 = arith.addf %0, %22 : vector<8x8x32xf32>
    %cst_21 = arith.constant dense<0.000000e+00> : vector<8x8xf32>
    %24 = vector.multi_reduction <add>, %23, %cst_21 [2] : vector<8x8x32xf32> to vector<8x8xf32>
    %25 = vector.shape_cast %24 : vector<8x8xf32> to vector<8x8x1xf32>
    %cst_22 = arith.constant 3.200000e+01 : f32
    %26 = vector.broadcast %cst_22 : f32 to vector<8x8x1xf32>
    %27 = arith.divf %25, %26 : vector<8x8x1xf32>
    %28 = vector.broadcast %27 : vector<8x8x1xf32> to vector<8x8x32xf32>
    %29 = arith.subf %23, %28 : vector<8x8x32xf32>
    %30 = arith.mulf %29, %29 : vector<8x8x32xf32>
    %cst_23 = arith.constant dense<0.000000e+00> : vector<8x8xf32>
    %31 = vector.multi_reduction <add>, %30, %cst_23 [2] : vector<8x8x32xf32> to vector<8x8xf32>
    %32 = vector.shape_cast %31 : vector<8x8xf32> to vector<8x8x1xf32>
    %cst_24 = arith.constant 3.200000e+01 : f32
    %33 = vector.broadcast %cst_24 : f32 to vector<8x8x1xf32>
    %34 = arith.divf %32, %33 : vector<8x8x1xf32>
    %35 = vector.broadcast %27 : vector<8x8x1xf32> to vector<8x8x32xf32>
    %36 = arith.subf %23, %35 : vector<8x8x32xf32>
    %cst_25 = arith.constant 9.99999996E-13 : f32
    %37 = vector.broadcast %cst_25 : f32 to vector<8x8x1xf32>
    %38 = arith.addf %34, %37 : vector<8x8x1xf32>
    %39 = math.rsqrt %38 : vector<8x8x1xf32>
    %40 = vector.broadcast %39 : vector<8x8x1xf32> to vector<8x8x32xf32>
    %41 = arith.mulf %36, %40 : vector<8x8x32xf32>
    %42 = vector.shape_cast %9 : vector<1x32xf32> to vector<1x1x32xf32>
    %43 = vector.broadcast %42 : vector<1x1x32xf32> to vector<8x8x32xf32>
    %44 = arith.mulf %41, %43 : vector<8x8x32xf32>
    %45 = vector.shape_cast %10 : vector<1x32xf32> to vector<1x1x32xf32>
    %46 = vector.broadcast %45 : vector<1x1x32xf32> to vector<8x8x32xf32>
    %47 = arith.addf %44, %46 : vector<8x8x32xf32>
    %48 = vector.shape_cast %47 : vector<8x8x32xf32> to vector<64x32xf32>
    %c0_26 = arith.constant 0 : index
    %c0_27 = arith.constant 0 : index
    %49 = vector.load %arg3[%c0_26, %c0_27] : memref<32x128xbf16, #tpu.memory_space<vmem>>, vector<32x128xbf16>
    %50 = arith.truncf %48 : vector<64x32xf32> to vector<64x32xbf16>
    %cst_28 = arith.constant dense<0.000000e+00> : vector<64x128xf32>
    %51 = tpu.matmul %50, %49, %cst_28 {dimension_numbers = #tpu.dot_dimension_numbers<[1], [0], [0], [1], [0, 0, 1, 1], [], []>} : vector<64x32xbf16>, vector<32x128xbf16>, vector<64x128xf32> -> vector<64x128xf32>
    %52 = vector.broadcast %7 : vector<1x128xf32> to vector<64x128xf32>
    %53 = arith.addf %51, %52 : vector<64x128xf32>
    %54 = vector.extract_strided_slice %53 {offsets = [0, 0], sizes = [64, 32], strides = [1, 1]} : vector<64x128xf32> to vector<64x32xf32>
    %55 = vector.extract_strided_slice %53 {offsets = [0, 32], sizes = [64, 32], strides = [1, 1]} : vector<64x128xf32> to vector<64x32xf32>
    %56 = vector.extract_strided_slice %53 {offsets = [0, 64], sizes = [64, 32], strides = [1, 1]} : vector<64x128xf32> to vector<64x32xf32>
    %57 = vector.extract_strided_slice %53 {offsets = [0, 96], sizes = [64, 32], strides = [1, 1]} : vector<64x128xf32> to vector<64x32xf32>
    %58 = vector.shape_cast %54 : vector<64x32xf32> to vector<8x8x32xf32>
    %59 = vector.shape_cast %55 : vector<64x32xf32> to vector<8x8x32xf32>
    %60 = vector.broadcast %5 : vector<64x1xf32> to vector<64x32xf32>
    %61 = arith.addf %56, %60 : vector<64x32xf32>
    %62 = vector.shape_cast %61 : vector<64x32xf32> to vector<8x8x32xf32>
    %cst_29 = arith.constant dense<0xFF800000> : vector<8x32xf32>
    %63 = vector.multi_reduction <maximumf>, %62, %cst_29 [1] : vector<8x8x32xf32> to vector<8x32xf32>
    %64 = vector.shape_cast %63 : vector<8x32xf32> to vector<8x1x32xf32>
    %65 = vector.broadcast %64 : vector<8x1x32xf32> to vector<8x8x32xf32>
    %66 = arith.subf %62, %65 : vector<8x8x32xf32>
    %67 = math.exp %66 : vector<8x8x32xf32>
    %cst_30 = arith.constant dense<0.000000e+00> : vector<8x32xf32>
    %68 = vector.multi_reduction <add>, %67, %cst_30 [1] : vector<8x8x32xf32> to vector<8x32xf32>
    %69 = vector.shape_cast %68 : vector<8x32xf32> to vector<8x1x32xf32>
    %70 = tpu.reciprocal %69 {approx = true} : vector<8x1x32xf32> -> vector<8x1x32xf32>
    %71 = vector.broadcast %70 : vector<8x1x32xf32> to vector<8x8x32xf32>
    %72 = arith.mulf %67, %71 : vector<8x8x32xf32>
    %73 = arith.mulf %72, %58 : vector<8x8x32xf32>
    %cst_31 = arith.constant dense<0.000000e+00> : vector<8x32xf32>
    %74 = vector.multi_reduction <add>, %73, %cst_31 [1] : vector<8x8x32xf32> to vector<8x32xf32>
    %75 = vector.shape_cast %74 : vector<8x32xf32> to vector<8x1x32xf32>
    %76 = vector.broadcast %75 : vector<8x1x32xf32> to vector<8x8x32xf32>
    %77 = arith.mulf %59, %76 : vector<8x8x32xf32>
    %78 = vector.shape_cast %77 : vector<8x8x32xf32> to vector<64x32xf32>
    %c0_32 = arith.constant 0 : index
    %c0_33 = arith.constant 0 : index
    %c0_34 = arith.constant 0 : index
    %79 = vector.load %arg4[%c0_32, %c0_33, %c0_34] : memref<2x32x32xbf16, #tpu.memory_space<vmem>>, vector<1x32x32xbf16>
    %80 = vector.shape_cast %79 : vector<1x32x32xbf16> to vector<32x32xbf16>
    %81 = arith.truncf %78 : vector<64x32xf32> to vector<64x32xbf16>
    %cst_35 = arith.constant dense<0.000000e+00> : vector<64x32xf32>
    %82 = tpu.matmul %81, %80, %cst_35 {dimension_numbers = #tpu.dot_dimension_numbers<[1], [0], [0], [1], [0, 0, 1, 1], [], []>} : vector<64x32xbf16>, vector<32x32xbf16>, vector<64x32xf32> -> vector<64x32xf32>
    %83 = vector.broadcast %8 : vector<1x32xf32> to vector<64x32xf32>
    %84 = arith.addf %82, %83 : vector<64x32xf32>
    %85 = vector.broadcast %5 : vector<64x1xf32> to vector<64x32xf32>
    %86 = arith.addf %84, %85 : vector<64x32xf32>
    %87 = vector.shape_cast %86 : vector<64x32xf32> to vector<8x8x32xf32>
    %cst_36 = arith.constant dense<0xFF800000> : vector<8x32xf32>
    %88 = vector.multi_reduction <maximumf>, %87, %cst_36 [1] : vector<8x8x32xf32> to vector<8x32xf32>
    %89 = vector.shape_cast %88 : vector<8x32xf32> to vector<8x1x32xf32>
    %90 = vector.broadcast %89 : vector<8x1x32xf32> to vector<8x8x32xf32>
    %91 = arith.subf %87, %90 : vector<8x8x32xf32>
    %92 = math.exp %91 : vector<8x8x32xf32>
    %cst_37 = arith.constant dense<0.000000e+00> : vector<8x32xf32>
    %93 = vector.multi_reduction <add>, %92, %cst_37 [1] : vector<8x8x32xf32> to vector<8x32xf32>
    %94 = vector.shape_cast %93 : vector<8x32xf32> to vector<8x1x32xf32>
    %95 = tpu.reciprocal %94 {approx = true} : vector<8x1x32xf32> -> vector<8x1x32xf32>
    %96 = vector.broadcast %95 : vector<8x1x32xf32> to vector<8x8x32xf32>
    %97 = arith.mulf %92, %96 : vector<8x8x32xf32>
    %98 = arith.mulf %97, %77 : vector<8x8x32xf32>
    %cst_38 = arith.constant dense<0.000000e+00> : vector<8x32xf32>
    %99 = vector.multi_reduction <add>, %98, %cst_38 [1] : vector<8x8x32xf32> to vector<8x32xf32>
    %100 = vector.shape_cast %99 : vector<8x32xf32> to vector<8x1x32xf32>
    %101 = vector.broadcast %100 : vector<8x1x32xf32> to vector<8x8x32xf32>
    %102 = arith.mulf %101, %58 : vector<8x8x32xf32>
    %103 = vector.shape_cast %102 : vector<8x8x32xf32> to vector<64x32xf32>
    %c1 = arith.constant 1 : index
    %c0_39 = arith.constant 0 : index
    %c0_40 = arith.constant 0 : index
    %104 = vector.load %arg4[%c1, %c0_39, %c0_40] : memref<2x32x32xbf16, #tpu.memory_space<vmem>>, vector<1x32x32xbf16>
    %105 = vector.shape_cast %104 : vector<1x32x32xbf16> to vector<32x32xbf16>
    %106 = arith.truncf %103 : vector<64x32xf32> to vector<64x32xbf16>
    %cst_41 = arith.constant dense<0.000000e+00> : vector<64x32xf32>
    %107 = tpu.matmul %106, %105, %cst_41 {dimension_numbers = #tpu.dot_dimension_numbers<[1], [0], [0], [1], [0, 0, 1, 1], [], []>} : vector<64x32xbf16>, vector<32x32xbf16>, vector<64x32xf32> -> vector<64x32xf32>
    %108 = vector.broadcast %11 : vector<1x32xf32> to vector<64x32xf32>
    %109 = arith.addf %107, %108 : vector<64x32xf32>
    %110 = arith.addf %109, %57 : vector<64x32xf32>
    %111 = arith.addf %110, %48 : vector<64x32xf32>
    %cst_42 = arith.constant dense<0.000000e+00> : vector<64xf32>
    %112 = vector.multi_reduction <add>, %111, %cst_42 [1] : vector<64x32xf32> to vector<64xf32>
    %113 = vector.shape_cast %112 : vector<64xf32> to vector<64x1xf32>
    %cst_43 = arith.constant 3.200000e+01 : f32
    %114 = vector.broadcast %cst_43 : f32 to vector<64x1xf32>
    %115 = arith.divf %113, %114 : vector<64x1xf32>
    %116 = vector.broadcast %115 : vector<64x1xf32> to vector<64x32xf32>
    %117 = arith.subf %111, %116 : vector<64x32xf32>
    %118 = arith.mulf %117, %117 : vector<64x32xf32>
    %cst_44 = arith.constant dense<0.000000e+00> : vector<64xf32>
    %119 = vector.multi_reduction <add>, %118, %cst_44 [1] : vector<64x32xf32> to vector<64xf32>
    %120 = vector.shape_cast %119 : vector<64xf32> to vector<64x1xf32>
    %cst_45 = arith.constant 3.200000e+01 : f32
    %121 = vector.broadcast %cst_45 : f32 to vector<64x1xf32>
    %122 = arith.divf %120, %121 : vector<64x1xf32>
    %123 = vector.broadcast %115 : vector<64x1xf32> to vector<64x32xf32>
    %124 = arith.subf %111, %123 : vector<64x32xf32>
    %cst_46 = arith.constant 9.99999996E-13 : f32
    %125 = vector.broadcast %cst_46 : f32 to vector<64x1xf32>
    %126 = arith.addf %122, %125 : vector<64x1xf32>
    %127 = math.rsqrt %126 : vector<64x1xf32>
    %128 = vector.broadcast %127 : vector<64x1xf32> to vector<64x32xf32>
    %129 = arith.mulf %124, %128 : vector<64x32xf32>
    %130 = vector.broadcast %12 : vector<1x32xf32> to vector<64x32xf32>
    %131 = arith.mulf %129, %130 : vector<64x32xf32>
    %132 = vector.broadcast %13 : vector<1x32xf32> to vector<64x32xf32>
    %133 = arith.addf %131, %132 : vector<64x32xf32>
    %c0_47 = arith.constant 0 : index
    %c0_48 = arith.constant 0 : index
    %134 = vector.load %arg5[%c0_47, %c0_48] : memref<32x64xbf16, #tpu.memory_space<vmem>>, vector<32x64xbf16>
    %135 = arith.truncf %133 : vector<64x32xf32> to vector<64x32xbf16>
    %cst_49 = arith.constant dense<0.000000e+00> : vector<64x64xf32>
    %136 = tpu.matmul %135, %134, %cst_49 {dimension_numbers = #tpu.dot_dimension_numbers<[1], [0], [0], [1], [0, 0, 1, 1], [], []>} : vector<64x32xbf16>, vector<32x64xbf16>, vector<64x64xf32> -> vector<64x64xf32>
    %137 = vector.broadcast %14 : vector<1x64xf32> to vector<64x64xf32>
    %138 = arith.addf %136, %137 : vector<64x64xf32>
    %cst_50 = arith.constant 5.000000e-01 : f32
    %139 = vector.broadcast %cst_50 : f32 to vector<64x64xf32>
    %140 = arith.mulf %139, %138 : vector<64x64xf32>
    %cst_51 = arith.constant 4.471500e-02 : f32
    %141 = vector.broadcast %cst_51 : f32 to vector<64x64xf32>
    %142 = arith.mulf %141, %138 : vector<64x64xf32>
    %143 = arith.mulf %142, %138 : vector<64x64xf32>
    %144 = arith.mulf %143, %138 : vector<64x64xf32>
    %145 = arith.addf %138, %144 : vector<64x64xf32>
    %cst_52 = arith.constant 0.797884583 : f32
    %146 = vector.broadcast %cst_52 : f32 to vector<64x64xf32>
    %147 = arith.mulf %146, %145 : vector<64x64xf32>
    %148 = math.tanh %147 : vector<64x64xf32>
    %cst_53 = arith.constant 1.000000e+00 : f32
    %149 = vector.broadcast %cst_53 : f32 to vector<64x64xf32>
    %150 = arith.addf %149, %148 : vector<64x64xf32>
    %151 = arith.mulf %140, %150 : vector<64x64xf32>
    %c0_54 = arith.constant 0 : index
    %c0_55 = arith.constant 0 : index
    %152 = vector.load %arg6[%c0_54, %c0_55] : memref<64x32xbf16, #tpu.memory_space<vmem>>, vector<64x32xbf16>
    %153 = arith.truncf %151 : vector<64x64xf32> to vector<64x64xbf16>
    %cst_56 = arith.constant dense<0.000000e+00> : vector<64x32xf32>
    %154 = tpu.matmul %153, %152, %cst_56 {dimension_numbers = #tpu.dot_dimension_numbers<[1], [0], [0], [1], [0, 0, 1, 1], [], []>} : vector<64x64xbf16>, vector<64x32xbf16>, vector<64x32xf32> -> vector<64x32xf32>
    %155 = vector.broadcast %15 : vector<1x32xf32> to vector<64x32xf32>
    %156 = arith.addf %154, %155 : vector<64x32xf32>
    %157 = arith.addf %156, %133 : vector<64x32xf32>
    %cst_57 = arith.constant dense<0.000000e+00> : vector<64xf32>
    %158 = vector.multi_reduction <add>, %157, %cst_57 [1] : vector<64x32xf32> to vector<64xf32>
    %159 = vector.shape_cast %158 : vector<64xf32> to vector<64x1xf32>
    %cst_58 = arith.constant 3.200000e+01 : f32
    %160 = vector.broadcast %cst_58 : f32 to vector<64x1xf32>
    %161 = arith.divf %159, %160 : vector<64x1xf32>
    %162 = vector.broadcast %161 : vector<64x1xf32> to vector<64x32xf32>
    %163 = arith.subf %157, %162 : vector<64x32xf32>
    %164 = arith.mulf %163, %163 : vector<64x32xf32>
    %cst_59 = arith.constant dense<0.000000e+00> : vector<64xf32>
    %165 = vector.multi_reduction <add>, %164, %cst_59 [1] : vector<64x32xf32> to vector<64xf32>
    %166 = vector.shape_cast %165 : vector<64xf32> to vector<64x1xf32>
    %cst_60 = arith.constant 3.200000e+01 : f32
    %167 = vector.broadcast %cst_60 : f32 to vector<64x1xf32>
    %168 = arith.divf %166, %167 : vector<64x1xf32>
    %169 = vector.broadcast %161 : vector<64x1xf32> to vector<64x32xf32>
    %170 = arith.subf %157, %169 : vector<64x32xf32>
    %cst_61 = arith.constant 9.99999996E-13 : f32
    %171 = vector.broadcast %cst_61 : f32 to vector<64x1xf32>
    %172 = arith.addf %168, %171 : vector<64x1xf32>
    %173 = math.rsqrt %172 : vector<64x1xf32>
    %174 = vector.broadcast %173 : vector<64x1xf32> to vector<64x32xf32>
    %175 = arith.mulf %170, %174 : vector<64x32xf32>
    %176 = vector.broadcast %16 : vector<1x32xf32> to vector<64x32xf32>
    %177 = arith.mulf %175, %176 : vector<64x32xf32>
    %178 = vector.broadcast %17 : vector<1x32xf32> to vector<64x32xf32>
    %179 = arith.addf %177, %178 : vector<64x32xf32>
    %c0_62 = arith.constant 0 : index
    %c0_63 = arith.constant 0 : index
    %180 = vector.load %arg7[%c0_62, %c0_63] : memref<32x16xbf16, #tpu.memory_space<vmem>>, vector<32x16xbf16>
    %181 = arith.truncf %179 : vector<64x32xf32> to vector<64x32xbf16>
    %cst_64 = arith.constant dense<0.000000e+00> : vector<64x16xf32>
    %182 = tpu.matmul %181, %180, %cst_64 {dimension_numbers = #tpu.dot_dimension_numbers<[1], [0], [0], [1], [0, 0, 1, 1], [], []>} : vector<64x32xbf16>, vector<32x16xbf16>, vector<64x16xf32> -> vector<64x16xf32>
    %183 = vector.broadcast %18 : vector<1x16xf32> to vector<64x16xf32>
    %184 = arith.addf %182, %183 : vector<64x16xf32>
    %185 = math.tanh %184 : vector<64x16xf32>
    %186 = vector.broadcast %20 : vector<1x16xf32> to vector<64x16xf32>
    %187 = arith.mulf %185, %186 : vector<64x16xf32>
    %cst_65 = arith.constant dense<0.000000e+00> : vector<64xf32>
    %188 = vector.multi_reduction <add>, %187, %cst_65 [1] : vector<64x16xf32> to vector<64xf32>
    %189 = vector.shape_cast %188 : vector<64xf32> to vector<64x1xf32>
    %190 = vector.broadcast %19 : vector<1x1xf32> to vector<64x1xf32>
    %191 = arith.addf %189, %190 : vector<64x1xf32>
    %192 = math.exp %191 : vector<64x1xf32>
    %193 = arith.mulf %192, %1 : vector<64x1xf32>
    %194 = vector.shape_cast %193 : vector<64x1xf32> to vector<8x8x1xf32>
    %cst_66 = arith.constant dense<0.000000e+00> : vector<8x1xf32>
    %195 = vector.multi_reduction <add>, %194, %cst_66 [1] : vector<8x8x1xf32> to vector<8x1xf32>
    %196 = vector.shape_cast %195 : vector<8x1xf32> to vector<8x1x1xf32>
    %cst_67 = arith.constant 9.99999993E-9 : f32
    %197 = vector.broadcast %cst_67 : f32 to vector<8x1x1xf32>
    %198 = arith.addf %196, %197 : vector<8x1x1xf32>
    %199 = tpu.reciprocal %198 {approx = true} : vector<8x1x1xf32> -> vector<8x1x1xf32>
    %200 = vector.broadcast %199 : vector<8x1x1xf32> to vector<8x8x1xf32>
    %201 = arith.mulf %194, %200 : vector<8x8x1xf32>
    %202 = vector.shape_cast %179 : vector<64x32xf32> to vector<8x8x32xf32>
    %203 = vector.broadcast %201 : vector<8x8x1xf32> to vector<8x8x32xf32>
    %204 = arith.mulf %202, %203 : vector<8x8x32xf32>
    %cst_68 = arith.constant dense<0.000000e+00> : vector<8x32xf32>
    %205 = vector.multi_reduction <add>, %204, %cst_68 [1] : vector<8x8x32xf32> to vector<8x32xf32>
    %c0_69 = arith.constant 0 : index
    %c0_70 = arith.constant 0 : index
    %206 = vector.load %arg9[%c0_69, %c0_70] : memref<8x32xf32, #tpu.memory_space<vmem>>, vector<8x32xf32>
    tpu.vector_store %arg9[%c0_69, %c0_70], %205 {strides = array<i32>} : memref<8x32xf32, #tpu.memory_space<vmem>>, vector<8x32xf32>,
    return
  }
  func.func @transform_0(%arg0: i32) -> (i32, i32, i32) {
    %c0_i32 = arith.constant 0 : i32
    %c0_i32_0 = arith.constant 0 : i32
    %c0_i32_1 = arith.constant 0 : i32
    return %arg0, %c0_i32, %c0_i32_0 : i32, i32, i32
  }
  func.func @transform_1(%arg0: i32) -> (i32, i32) {
    %c0_i32 = arith.constant 0 : i32
    %c0_i32_0 = arith.constant 0 : i32
    return %arg0, %c0_i32 : i32, i32
  }
  func.func @transform_2(%arg0: i32) -> (i32, i32) {
    %c0_i32 = arith.constant 0 : i32
    %c0_i32_0 = arith.constant 0 : i32
    %c0_i32_1 = arith.constant 0 : i32
    return %c0_i32, %c0_i32_0 : i32, i32
  }
  func.func @transform_3(%arg0: i32) -> (i32, i32, i32) {
    %c0_i32 = arith.constant 0 : i32
    %c0_i32_0 = arith.constant 0 : i32
    %c0_i32_1 = arith.constant 0 : i32
    %c0_i32_2 = arith.constant 0 : i32
    return %c0_i32, %c0_i32_0, %c0_i32_1 : i32, i32, i32
  }
  func.func @transform_4(%arg0: i32) -> (i32, i32) {
    %c0_i32 = arith.constant 0 : i32
    %c0_i32_0 = arith.constant 0 : i32
    %c0_i32_1 = arith.constant 0 : i32
    return %c0_i32, %c0_i32_0 : i32, i32
  }
  func.func @transform_5(%arg0: i32) -> (i32, i32) {
    %c0_i32 = arith.constant 0 : i32
    %c0_i32_0 = arith.constant 0 : i32
    %c0_i32_1 = arith.constant 0 : i32
    return %c0_i32, %c0_i32_0 : i32, i32
  }
  func.func @transform_6(%arg0: i32) -> (i32, i32) {
    %c0_i32 = arith.constant 0 : i32
    %c0_i32_0 = arith.constant 0 : i32
    %c0_i32_1 = arith.constant 0 : i32
    return %c0_i32, %c0_i32_0 : i32, i32
  }
  func.func @transform_7(%arg0: i32) -> (i32, i32) {
    %c0_i32 = arith.constant 0 : i32
    %c0_i32_0 = arith.constant 0 : i32
    %c0_i32_1 = arith.constant 0 : i32
    return %c0_i32, %c0_i32_0 : i32, i32
  }
  func.func @transform_8(%arg0: i32) -> (i32, i32) {
    %c0_i32 = arith.constant 0 : i32
    %c0_i32_0 = arith.constant 0 : i32
    return %arg0, %c0_i32 : i32, i32
  }
}

</mosaic_0001>

<bundles_post_ra>
// kernel: user_encoder_forward.1
= control target key start
LH: loop header
LB: loop body
LE: loop exit
PB: predicated region body
PF: predicated region fallthrough
CT: control target
= control target key end

     0   :  { %vm85_vm0 = vcmask 261120   ;;  %s2497_s24 = smov 64   ;;  %vm364_vm1 = vcmask 785920   ;;  %s2498_s25 = smov 96   ;;  %vm1513_vm2 = vcmask 523264   ;;  %vm1848_vm3 = vcmask 130048   ;;  %s3341_s0 = inlined_call_operand.vmem [shape: f32[8,8,32], index: 0, kind: input, shape index: {}]   ;;  %s3342_s7 = inlined_call_operand.vmem [shape: f32[22,128], index: 7, kind: input, shape index: {}]   ;;  %s3343_s2 = inlined_call_operand.vmem [shape: bf16[32,128], index: 2, kind: input, shape index: {}]   ;;  %s3344_s1 = inlined_call_operand.vmem [shape: f32[64,1], index: 1, kind: input, shape index: {}]   ;;  %s3345_s3 = inlined_call_operand.vmem [shape: bf16[2,32,32], index: 3, kind: input, shape index: {}]   ;;  %s3346_s4 = inlined_call_operand.vmem [shape: bf16[32,64], index: 4, kind: input, shape index: {}]   ;;  %s3347_s5 = inlined_call_operand.vmem [shape: bf16[64,32], index: 5, kind: input, shape index: {}]   ;;  %s3348_s6 = inlined_call_operand.vmem [shape: bf16[32,16], index: 6, kind: input, shape index: {}]   ;;  %s3349_s8 = inlined_call_operand.vmem [shape: f32[8,32], index: 8, kind: output, shape index: {}]  }
   0x1   :  { %v30_v0 = vld [vmem:[%s3341_s0] sm:$0xff]  ;;  %v32_v2 = vld [vmem:[%s3341_s0 + $0x10] sm:$0xff]  ;;  %v31_v5 = vld [vmem:[%s3341_s0 + $0x8] sm:$0xff]  ;;  %s2499_s30 = smov 32   ;;  %vm1909_vm4 = vcmask 7168   ;;  %vm2102_vm5 = vcmask 1041409  }
   0x2   :  { %v62_v1 = vld [vmem:[%s3342_s7] sm:$0xff]  ;;  %v33_v6 = vld [vmem:[%s3341_s0 + $0x18] sm:$0xff]  ;;  %v35_v10 = vld [vmem:[%s3341_s0 + $0x28] sm:$0xff]  ;;  %vm2104_vm6 = vcmask 1042434   ;;  %vm2106_vm7 = vcmask 1043459   ;;  %vm2108_vm8 = vcmask 1044484  }
   0x3   :  { %v77_v3 = vadd.f32 %v62_v1, %v30_v0  ;;  %v79_v4 = vadd.f32 %v62_v1, %v32_v2  ;;  %v78_v7 = vadd.f32 %v62_v1, %v31_v5  ;;  %v80_v8 = vadd.f32 %v62_v1, %v33_v6  ;;  %v34_v9 = vld [vmem:[%s3341_s0 + $0x20] sm:$0xff]  ;;  %v36_v17 = vld [vmem:[%s3341_s0 + $0x30] sm:$0xff]  ;;  %v37_v18 = vld [vmem:[%s3341_s0 + $0x38] sm:$0xff] }
   0x4   :  { %v81_v15 = vadd.f32 %v62_v1, %v34_v9  ;;  %v82_v16 = vadd.f32 %v62_v1, %v35_v10  ;;  %v83_v21 = vadd.f32 %v62_v1, %v36_v17  ;;  %v84_v22 = vadd.f32 %v62_v1, %v37_v18  ;;  %v2298_v1 = vld [vmem:[%s3343_s2 + $0x8] sm:$0xff]   ;;  %v2299_v2 = vld [vmem:[%s3343_s2] sm:$0xff]   ;;  %v40_v5 = vld [vmem:[%s3344_s1 + $0x10] sm:$0xff] }
   0x5   :  { %v86_v11 = vsel %vm85_vm0, %v77_v3, 0.0  ;;  %v92_v12 = vsel %vm85_vm0, %v79_v4, 0.0  ;;  %v89_v13 = vsel %vm85_vm0, %v78_v7, 0.0  ;;  %v95_v14 = vsel %vm85_vm0, %v80_v8, 0.0  ;;  %2216 = vmatprep.subr.bf16.mxu0 %v2298_v1  ;;  %v41_v9 = vld [vmem:[%s3344_s1 + $0x18] sm:$0xff]  ;;  %v43_v18 = vld [vmem:[%s3344_s1 + $0x28] sm:$0xff] }
   0x6   :  { %87 = vadd.xlane.f32.xlu0 %v86_v11  ;;  %93 = vadd.xlane.f32.xlu1 %v92_v12  ;;  %v98_v19 = vsel %vm85_vm0, %v81_v15, 0.0  ;;  %v101_v20 = vsel %vm85_vm0, %v82_v16, 0.0  ;;  %v104_v23 = vsel %vm85_vm0, %v83_v21, 0.0  ;;  %v107_v24 = vsel %vm85_vm0, %v84_v22, 0.0 }
   0x7   :  { %2217 = vmatpush3.bf16.msra.mxu0 %v2298_v1  ;;  %vm2110_vm9 = vcmask 1045509   ;;  %vm2112_vm10 = vcmask 1046534   ;;  %vm2114_vm11 = vcmask 1047559  }
   0x8   :  { %2218 = vmatprep.subr.bf16.mxu0 %v2299_v2 }
   0xa   :  { %90 = vadd.xlane.f32.xlu0 %v89_v13  ;;  %96 = vadd.xlane.f32.xlu1 %v95_v14  ;;  %v49_v14 = vsub.f32 1.0, %v41_v9 }
   0xb   :  { %2219 = vmatpush3.bf16.msra.mxu0 %v2299_v2 }
   0xe   :  { %99 = vadd.xlane.f32.xlu0 %v98_v19  ;;  %102 = vadd.xlane.f32.xlu1 %v101_v20  ;;  %v51_v20 = vsub.f32 1.0, %v43_v18 }
  0x12   :  { %105 = vadd.xlane.f32.xlu0 %v104_v23  ;;  %108 = vadd.xlane.f32.xlu1 %v107_v24  ;;  %v45_v24 = vld [vmem:[%s3344_s1 + $0x38] sm:$0xff] }
  0x8f   :  { %v88_v25 = vpop.xlane.xlu0 %87  ;;  %v94_v26 = vpop.xlane.xlu1 %93 }
  0x90   :  { %v111_v27 = vmul.f32 0.03125, %v88_v25  ;;  %v113_v28 = vmul.f32 0.03125, %v94_v26  ;;  %v53_v26 = vsub.f32 1.0, %v45_v24 }
  0x92   :  { %v2580_v29 = vsub.f32 %v77_v3, %v111_v27  ;;  %v2582_v30 = vsub.f32 %v79_v4, %v113_v28  ;;  %v2496_v3 = vmov 0   ;;  %v39_v4 = vld [vmem:[%s3344_s1 + $0x8] sm:$0xff]  ;;  %v61_v27 = vmul.f32 -10000.0, %v53_v26 }
  0x93   :  { %v91_v31 = vpop.xlane.xlu0 %90  ;;  %v97_v32 = vpop.xlane.xlu1 %96  ;;  %2297 = vset.pattern.permute.xlu1 %v2496_v3  ;;  %2296 = vset.pattern.permute.xlu0 %v2496_v3  ;;  %v47_v6 = vsub.f32 1.0, %v39_v4  ;;  %v2123_v3 = vld [vmem:[%s3342_s7 + $0xb] ss:$0 sm:$0xff] }
  0x94   :  { %v112_v33 = vmul.f32 0.03125, %v91_v31  ;;  %v114_v34 = vmul.f32 0.03125, %v97_v32  ;;  %v127_v35 = vmul.f32 %v2580_v29, %v2580_v29  ;;  %v129_v36 = vmul.f32 %v2582_v30, %v2582_v30 }
  0x95   :  { %v55_v11 = vmul.f32 -10000.0, %v47_v6 }
  0x96   :  { %v2588_v37 = vsub.f32 %v78_v7, %v112_v33  ;;  %v2590_v38 = vsub.f32 %v80_v8, %v114_v34  ;;  %v135_v39 = vsel %vm85_vm0, %v127_v35, 0.0  ;;  %v141_v42 = vsel %vm85_vm0, %v129_v36, 0.0  ;;  %v38_v8 = vld [vmem:[%s3344_s1] sm:$0xff] }
  0x97   :  { %136 = vadd.xlane.f32.xlu0 %v135_v39  ;;  %v100_v40 = vpop.xlane.xlu0 %99  ;;  %v103_v41 = vpop.xlane.xlu1 %102  ;;  %v48_v7 = vsub.f32 1.0, %v40_v5  ;;  %v46_v10 = vsub.f32 1.0, %v38_v8 }
  0x98   :  { %v115_v43 = vmul.f32 0.03125, %v100_v40  ;;  %v116_v44 = vmul.f32 0.03125, %v103_v41  ;;  %v128_v45 = vmul.f32 %v2588_v37, %v2588_v37  ;;  %v130_v46 = vmul.f32 %v2590_v38, %v2590_v38 }
  0x99   :  { %v54_v12 = vmul.f32 -10000.0, %v46_v10  ;;  %v56_v13 = vmul.f32 -10000.0, %v48_v7 }
  0x9a   :  { %v2598_v47 = vsub.f32 %v81_v15, %v115_v43  ;;  %v2600_v48 = vsub.f32 %v82_v16, %v116_v44  ;;  %v138_v49 = vsel %vm85_vm0, %v128_v45, 0.0  ;;  %v144_v52 = vsel %vm85_vm0, %v130_v46, 0.0  ;;  %v42_v15 = vld [vmem:[%s3344_s1 + $0x20] sm:$0xff] }
  0x9b   :  { %142 = vadd.xlane.f32.xlu0 %v141_v42  ;;  %139 = vadd.xlane.f32.xlu1 %v138_v49  ;;  %v106_v50 = vpop.xlane.xlu0 %105  ;;  %v109_v51 = vpop.xlane.xlu1 %108  ;;  %v57_v16 = vmul.f32 -10000.0, %v49_v14  ;;  %v50_v17 = vsub.f32 1.0, %v42_v15 }
  0x9c   :  { %v117_v53 = vmul.f32 0.03125, %v106_v50  ;;  %v118_v54 = vmul.f32 0.03125, %v109_v51  ;;  %v131_v55 = vmul.f32 %v2598_v47, %v2598_v47  ;;  %v132_v56 = vmul.f32 %v2600_v48, %v2600_v48 }
  0x9d   :  { %v58_v19 = vmul.f32 -10000.0, %v50_v17 }
  0x9e   :  { %v2608_v57 = vsub.f32 %v83_v21, %v117_v53  ;;  %v2610_v58 = vsub.f32 %v84_v22, %v118_v54  ;;  %v147_v59 = vsel %vm85_vm0, %v131_v55, 0.0  ;;  %v150_v60 = vsel %vm85_vm0, %v132_v56, 0.0  ;;  %v44_v21 = vld [vmem:[%s3344_s1 + $0x30] sm:$0xff] }
  0x9f   :  { %145 = vadd.xlane.f32.xlu1 %v144_v52  ;;  %148 = vadd.xlane.f32.xlu0 %v147_v59  ;;  %v59_v22 = vmul.f32 -10000.0, %v51_v20  ;;  %v52_v23 = vsub.f32 1.0, %v44_v21 }
  0xa0   :  { %v133_v61 = vmul.f32 %v2608_v57, %v2608_v57  ;;  %v134_v62 = vmul.f32 %v2610_v58, %v2610_v58 }
  0xa1   :  { %v60_v25 = vmul.f32 -10000.0, %v52_v23 }
  0xa2   :  { %v153_v63 = vsel %vm85_vm0, %v133_v61, 0.0  ;;  %v156_v0 = vsel %vm85_vm0, %v134_v62, 0.0  ;;  %v2122_v62 = vld [vmem:[%s3342_s7 + $0xa] ss:$0 sm:$0xff] }
  0xa3   :  { %151 = vadd.xlane.f32.xlu1 %v150_v60  ;;  %154 = vadd.xlane.f32.xlu0 %v153_v63 }
  0xa7   :  { %157 = vadd.xlane.f32.xlu1 %v156_v0 }
  0xb8   :  { %323 = vperm.xlu1 %2297, %v55_v11  }
  0xb9   :  { %318 = vperm.xlu0 %2296, %v54_v12  }
  0xbc   :  { %328 = vperm.xlu1 %2297, %v56_v13  }
  0xc0   :  { %333 = vperm.xlu1 %2297, %v57_v16  }
  0xc4   :  { %338 = vperm.xlu1 %2297, %v58_v19  }
  0xc8   :  { %343 = vperm.xlu1 %2297, %v59_v22  }
  0xcc   :  { %348 = vperm.xlu1 %2297, %v60_v25  }
  0xd0   :  { %353 = vperm.xlu1 %2297, %v61_v27  }
 0x120   :  { %v137_v28 = vpop.xlane.xlu0 %136 }
 0x121   :  { %v159_v31 = vmul.f32 0.03125, %v137_v28 }
 0x123   :  { %v167_v32 = vadd.f32 1e-12, %v159_v31 }
 0x124   :  { %v140_v33 = vpop.xlane.xlu1 %139  ;;  %v143_v34 = vpop.xlane.xlu0 %142 }
 0x125   :  { %2312 = vrsqrt.f32 %v167_v32  ;;  %v160_v35 = vmul.f32 0.03125, %v140_v33  ;;  %v161_v36 = vmul.f32 0.03125, %v143_v34 }
 0x127   :  { %v168_v39 = vadd.f32 1e-12, %v160_v35  ;;  %v169_v40 = vadd.f32 1e-12, %v161_v36 }
 0x128   :  { %v146_v41 = vpop.xlane.xlu1 %145  ;;  %v149_v42 = vpop.xlane.xlu0 %148 }
 0x129   :  { %2314 = vrsqrt.f32 %v168_v39  ;;  %v162_v43 = vmul.f32 0.03125, %v146_v41  ;;  %v163_v44 = vmul.f32 0.03125, %v149_v42 }
 0x12a   :  { %2316 = vrsqrt.f32 %v169_v40 }
 0x12b   :  { %v170_v45 = vadd.f32 1e-12, %v162_v43  ;;  %v171_v46 = vadd.f32 1e-12, %v163_v44 }
 0x12c   :  { %v152_v49 = vpop.xlane.xlu1 %151  ;;  %v155_v50 = vpop.xlane.xlu0 %154 }
 0x12d   :  { %2318 = vrsqrt.f32 %v170_v45  ;;  %v164_v51 = vmul.f32 0.03125, %v152_v49  ;;  %v165_v52 = vmul.f32 0.03125, %v155_v50 }
 0x12e   :  { %2320 = vrsqrt.f32 %v171_v46 }
 0x12f   :  { %v172_v53 = vadd.f32 1e-12, %v164_v51  ;;  %v173_v54 = vadd.f32 1e-12, %v165_v52 }
 0x130   :  { %v158_v55 = vpop.xlane.xlu1 %157 }
 0x131   :  { %2322 = vrsqrt.f32 %v172_v53  ;;  %v166_v56 = vmul.f32 0.03125, %v158_v55 }
 0x132   :  { %v2313_v59 = vpop.eup %2312  ;;  %2324 = vrsqrt.f32 %v173_v54 }
 0x133   :  { %v174_v60 = vadd.f32 1e-12, %v166_v56  ;;  %v183_v61 = vmul.f32 %v2313_v59, %v2580_v29 }
 0x134   :  { %v2692_v27 = vpop.permute.xlu1 %323  ;;  %v2722_v52 = vpop.permute.xlu0 %318 }
 0x135   :  { %2326 = vrsqrt.f32 %v174_v60  ;;  %v195_v2 = vmul.f32 %v2122_v62, %v183_v61 }
 0x136   :  { %v2315_v63 = vpop.eup %2314 }
 0x137   :  { %v2317_v0 = vpop.eup %2316  ;;  %v184_v1 = vmul.f32 %v2315_v63, %v2588_v37  ;;  %v2659_v29 = vadd.f32 %v2123_v3, %v195_v2 }
 0x138   :  { %v185_v4 = vmul.f32 %v2317_v0, %v2582_v30  ;;  %v2697_v32 = vpop.permute.xlu1 %328 }
 0x139   :  { %v196_v5 = vmul.f32 %v2122_v62, %v184_v1 }
 0x13a   :  { %v2319_v6 = vpop.eup %2318  ;;  %v197_v10 = vmul.f32 %v2122_v62, %v185_v4 }
 0x13b   :  { %v2321_v7 = vpop.eup %2320  ;;  %v2661_v8 = vadd.f32 %v2123_v3, %v196_v5  ;;  %v186_v9 = vmul.f32 %v2319_v6, %v2590_v38 }
 0x13c   :  { %v187_v11 = vmul.f32 %v2321_v7, %v2598_v47  ;;  %v2668_v30 = vadd.f32 %v2123_v3, %v197_v10  ;;  %v2706_v41 = vpop.permute.xlu1 %333 }
 0x13d   :  { %v219_v37 = vpack.c.bf16 %v2661_v8, %v2659_v29  ;;  %v198_v12 = vmul.f32 %v2122_v62, %v186_v9 }
 0x13e   :  { %v2323_v13 = vpop.eup %2322  ;;  %v199_v17 = vmul.f32 %v2122_v62, %v187_v11 }
 0x13f   :  { %v2325_v14 = vpop.eup %2324  ;;  %2220 = vmatprep.mubr.msk.bf16.mxu0 %vm85_vm0, %v219_v37  ;;  %v2670_v15 = vadd.f32 %v2123_v3, %v198_v12  ;;  %v188_v16 = vmul.f32 %v2323_v13, %v2600_v48 }
 0x140   :  { %v189_v38 = vmul.f32 %v2325_v14, %v2608_v57  ;;  %v2677_v20 = vadd.f32 %v2123_v3, %v199_v17  ;;  %v2716_v49 = vpop.permute.xlu1 %338 }
 0x141   :  { %v220_v47 = vpack.c.bf16 %v2670_v15, %v2668_v30  ;;  %v200_v18 = vmul.f32 %v2122_v62, %v188_v16 }
 0x142   :  { %v2327_v19 = vpop.eup %2326  ;;  %v201_v23 = vmul.f32 %v2122_v62, %v189_v38 }
 0x143   :  { %2221 = vmatmul.mubr.msk.bf16.vlgmr.msra.gmra.mxu0 %vm85_vm0, %v220_v47  ;;  %v2679_v21 = vadd.f32 %v2123_v3, %v200_v18  ;;  %v190_v22 = vmul.f32 %v2327_v19, %v2610_v58  ;;  %v2124_v58 = vld [vmem:[%s3342_s7 + $0x8] ss:$0 sm:$0xff] }
 0x144   :  { %v2685_v57 = vadd.f32 %v2123_v3, %v201_v23  ;;  %v2732_v55 = vpop.permute.xlu1 %343 }
 0x145   :  { %v221_v48 = vpack.c.bf16 %v2679_v21, %v2677_v20  ;;  %v202_v24 = vmul.f32 %v2122_v62, %v190_v22 }
 0x147   :  { %2224 = vmatprep.mubr.msk.bf16.mxu0 %vm85_vm0, %v221_v48  ;;  %v2687_v25 = vadd.f32 %v2123_v3, %v202_v24 }
 0x148   :  { %v2751_v0 = vpop.permute.xlu1 %348 }
 0x149   :  { %v222_v26 = vpack.c.bf16 %v2687_v25, %v2685_v57 }
 0x14b   :  { %2225 = vmatmul.mubr.msk.bf16.gmra.mxu0 %vm85_vm0, %v222_v26 }
 0x14c   :  { %v2771_v11 = vpop.permute.xlu1 %353 }
 0x203   :  { %v2222_v28 = vpop.f32.mrf.mxu0 }
 0x204   :  { %v2702_v36 = vadd.f32 %v2222_v28, %v2124_v58 }
 0x205   :  { %v285_v31 = vpop.f32.mrf.mxu0 }
 0x206   :  { %v2699_v33 = vadd.f32 %v2124_v58, %v285_v31  ;;  %v2737_v56 = vadd.f32 %v2697_v32, %v2702_v36 }
 0x207   :  { %v2223_v34 = vpop.f32.mrf.mxu0 }
 0x208   :  { %525 = vrot.lane.b32.xlu1 %v2699_v33, %s2497_s24  ;;  %v2710_v43 = vadd.f32 %v2223_v34, %v2124_v58  ;;  %v2728_v53 = vadd.f32 %v2722_v52, %v2699_v33  ;;  %v379_v62 = vsel %vm364_vm1, %v2737_v56, -inf }
 0x209   :  { %v288_v35 = vpop.f32.mrf.mxu0  ;;  %v380_v3 = vrot.slane %v379_v62, 4 }
 0x20a   :  { %v2704_v39 = vadd.f32 %v2124_v58, %v288_v35  ;;  %v365_v59 = vsel %vm364_vm1, %v2728_v53, -inf  ;;  %v2749_v63 = vadd.f32 %v2706_v41, %v2710_v43 }
 0x20b   :  { %v2226_v40 = vpop.f32.mrf.mxu0  ;;  %v366_v61 = vrot.slane %v365_v59, 4  ;;  %v381_v37 = vmax.f32 %v379_v62, %v380_v3 }
 0x20c   :  { %527 = vrot.lane.b32.xlu0 %v2704_v39, %s2497_s24  ;;  %529 = vrot.lane.b32.xlu1 %v2702_v36, %s2497_s24  ;;  %v2718_v50 = vadd.f32 %v2226_v40, %v2124_v58  ;;  %v2743_v60 = vadd.f32 %v2692_v27, %v2704_v39  ;;  %v386_v5 = vsel %vm364_vm1, %v2749_v63, -inf }
 0x20d   :  { %v301_v42 = vpop.f32.mrf.mxu0  ;;  %v367_v4 = vmax.f32 %v365_v59, %v366_v61  ;;  %v387_v12 = vrot.slane %v386_v5, 4  ;;  %v382_v18 = vrot.slane %v381_v37, 2 }
 0x20e   :  { %v2712_v44 = vadd.f32 %v2124_v58, %v301_v42  ;;  %v372_v1 = vsel %vm364_vm1, %v2743_v60, -inf  ;;  %v2763_v7 = vadd.f32 %v2751_v0, %v2718_v50 }
 0x20f   :  { %v2227_v45 = vpop.f32.mrf.mxu0  ;;  %v373_v6 = vrot.slane %v372_v1, 4  ;;  %v368_v13 = vrot.slane %v367_v4, 2  ;;  %v388_v19 = vmax.f32 %v386_v5, %v387_v12 }
 0x210   :  { %531 = vrot.lane.b32.xlu0 %v2710_v43, %s2497_s24  ;;  %533 = vrot.lane.b32.xlu1 %v2712_v44, %s2497_s24  ;;  %v2730_v54 = vadd.f32 %v2227_v45, %v2124_v58  ;;  %v2757_v2 = vadd.f32 %v2716_v49, %v2712_v44  ;;  %v407_v16 = vsel %vm364_vm1, %v2763_v7, -inf }
 0x211   :  { %v304_v46 = vpop.f32.mrf.mxu0  ;;  %v374_v14 = vmax.f32 %v372_v1, %v373_v6  ;;  %v369_v22 = vmax.f32 %v367_v4, %v368_v13  ;;  %v408_v23 = vrot.slane %v407_v16, 4  ;;  %v389_v31 = vrot.slane %v388_v19, 2 }
 0x212   :  { %v2720_v51 = vadd.f32 %v2124_v58, %v304_v46  ;;  %v393_v9 = vsel %vm364_vm1, %v2757_v2, -inf  ;;  %v2777_v38 = vadd.f32 %v2771_v11, %v2730_v54  ;;  %v383_v58 = vmax.f32 %v381_v37, %v382_v18 }
 0x213   :  { %v394_v17 = vrot.slane %v393_v9, 4  ;;  %v375_v48 = vrot.slane %v374_v14, 2  ;;  %v370_v34 = vrot.slane %v369_v22, 1  ;;  %v409_v35 = vmax.f32 %v407_v16, %v408_v23 }
 0x214   :  { %535 = vrot.lane.b32.xlu0 %v2720_v51, %s2497_s24  ;;  %537 = vrot.lane.b32.xlu1 %v2718_v50, %s2497_s24  ;;  %v2769_v10 = vadd.f32 %v2732_v55, %v2720_v51  ;;  %v414_v28 = vsel %vm364_vm1, %v2777_v38, -inf  ;;  %v384_v59 = vrot.slane %v383_v58, 1  ;;  %v390_v61 = vmax.f32 %v388_v19, %v389_v31 }
 0x215   :  { %v395_v24 = vmax.f32 %v393_v9, %v394_v17  ;;  %v376_v40 = vmax.f32 %v374_v14, %v375_v48  ;;  %v415_v45 = vrot.slane %v414_v28, 4  ;;  %v371_v62 = vmax.f32 %v369_v22, %v370_v34 }
 0x216   :  { %v400_v47 = vsel %vm364_vm1, %v2769_v10, -inf  ;;  %v410_v1 = vrot.slane %v409_v35, 2  ;;  %v385_v9 = vmax.f32 %v383_v58, %v384_v59  ;;  %v391_v12 = vrot.slane %v390_v61, 1 }
 0x217   :  { %v401_v26 = vrot.slane %v400_v47, 4  ;;  %v396_v42 = vrot.slane %v395_v24, 2  ;;  %v377_v3 = vrot.slane %v376_v40, 1  ;;  %v416_v5 = vmax.f32 %v414_v28, %v415_v45 }
 0x218   :  { %539 = vrot.lane.b32.xlu0 %v2730_v54, %s2497_s24  ;;  %v421_v13 = vsub.f32 %v2728_v53, %v371_v62  ;;  %v411_v37 = vmax.f32 %v409_v35, %v410_v1  ;;  %v423_v23 = vsub.f32 %v2737_v56, %v385_v9 }
 0x219   :  { %v402_v46 = vmax.f32 %v400_v47, %v401_v26  ;;  %v397_v4 = vmax.f32 %v395_v24, %v396_v42  ;;  %v378_v17 = vmax.f32 %v376_v40, %v377_v3  ;;  %v417_v16 = vrot.slane %v416_v5, 2 }
 0x21a   :  { %v392_v47 = vmax.f32 %v390_v61, %v391_v12  ;;  %v429_v48 = vmul.f32 1.442695, %v421_v13  ;;  %v412_v19 = vrot.slane %v411_v37, 1  ;;  %v433_v31 = vmul.f32 1.442695, %v423_v23 }
 0x21b   :  { %v403_v6 = vrot.slane %v402_v46, 2  ;;  %v398_v18 = vrot.slane %v397_v4, 1  ;;  %v422_v22 = vsub.f32 %v2743_v60, %v378_v17  ;;  %v418_v24 = vmax.f32 %v416_v5, %v417_v16 }
 0x21c   :  { %v424_v58 = vsub.f32 %v2749_v63, %v392_v47  ;;  %2328 = vpow2.f32 %v429_v48  ;;  %v413_v53 = vmax.f32 %v411_v37, %v412_v19 }
 0x21d   :  { %v404_v14 = vmax.f32 %v402_v46, %v403_v6  ;;  %v399_v26 = vmax.f32 %v397_v4, %v398_v18  ;;  %v431_v34 = vmul.f32 1.442695, %v422_v22  ;;  %v419_v40 = vrot.slane %v418_v24, 1 }
 0x21e   :  { %2330 = vpow2.f32 %v433_v31  ;;  %v435_v56 = vmul.f32 1.442695, %v424_v58  ;;  %v427_v45 = vsub.f32 %v2763_v7, %v413_v53 }
 0x21f   :  { %v405_v28 = vrot.slane %v404_v14, 1  ;;  %v425_v35 = vsub.f32 %v2757_v2, %v399_v26  ;;  %2332 = vpow2.f32 %v431_v34  ;;  %v420_v60 = vmax.f32 %v418_v24, %v419_v40 }
 0x220   :  { %2334 = vpow2.f32 %v435_v56  ;;  %v441_v61 = vmul.f32 1.442695, %v427_v45 }
 0x221   :  { %v406_v42 = vmax.f32 %v404_v14, %v405_v28  ;;  %v437_v46 = vmul.f32 1.442695, %v425_v35  ;;  %v428_v63 = vsub.f32 %v2777_v38, %v420_v60 }
 0x223   :  { %v426_v59 = vsub.f32 %v2769_v10, %v406_v42  ;;  %2336 = vpow2.f32 %v437_v46  ;;  %v443_v2 = vmul.f32 1.442695, %v428_v63 }
 0x224   :  { %2338 = vpow2.f32 %v441_v61 }
 0x225   :  { %v439_v62 = vmul.f32 1.442695, %v426_v59 }
 0x227   :  { %2340 = vpow2.f32 %v439_v62 }
 0x228   :  { %2342 = vpow2.f32 %v443_v2 }
 0x229   :  { %v2791_v1 = vpop.eup %2328 }
 0x22a   :  { %v445_v3 = vsel %vm364_vm1, %v2791_v1, 0.0 }
 0x22b   :  { %v2795_v7 = vpop.eup %2330  ;;  %v446_v10 = vrot.slane %v445_v3, 4 }
 0x22c   :  { %v2797_v4 = vpop.eup %2332  ;;  %v459_v5 = vsel %vm364_vm1, %v2795_v7, 0.0 }
 0x22d   :  { %v2801_v6 = vpop.eup %2334  ;;  %v452_v38 = vsel %vm364_vm1, %v2797_v4, 0.0  ;;  %v447_v12 = vadd.f32 %v446_v10, %v445_v3  ;;  %v460_v13 = vrot.slane %v459_v5, 4 }
 0x22e   :  { %v453_v37 = vrot.slane %v452_v38, 4  ;;  %v466_v17 = vsel %vm364_vm1, %v2801_v6, 0.0 }
 0x22f   :  { %v448_v23 = vrot.slane %v447_v12, 2  ;;  %v461_v47 = vadd.f32 %v460_v13, %v459_v5  ;;  %v467_v48 = vrot.slane %v466_v17, 4 }
 0x230   :  { %v2805_v9 = vpop.eup %2336  ;;  %v454_v22 = vadd.f32 %v453_v37, %v452_v38 }
 0x231   :  { %v2809_v18 = vpop.eup %2338  ;;  %v473_v16 = vsel %vm364_vm1, %v2805_v9, 0.0  ;;  %v449_v58 = vadd.f32 %v448_v23, %v447_v12  ;;  %v462_v53 = vrot.slane %v461_v47, 2  ;;  %v468_v34 = vadd.f32 %v467_v48, %v466_v17 }
 0x232   :  { %v487_v19 = vsel %vm364_vm1, %v2809_v18, 0.0  ;;  %v474_v26 = vrot.slane %v473_v16, 4  ;;  %v455_v35 = vrot.slane %v454_v22, 2 }
 0x233   :  { %v488_v31 = vrot.slane %v487_v19, 4  ;;  %v450_v46 = vrot.slane %v449_v58, 1  ;;  %v463_v60 = vadd.f32 %v462_v53, %v461_v47  ;;  %v469_v59 = vrot.slane %v468_v34, 2 }
 0x234   :  { %v2813_v14 = vpop.eup %2340  ;;  %v475_v40 = vadd.f32 %v474_v26, %v473_v16  ;;  %v456_v63 = vadd.f32 %v455_v35, %v454_v22 }
 0x235   :  { %v480_v24 = vsel %vm364_vm1, %v2813_v14, 0.0  ;;  %v2819_v28 = vpop.eup %2342  ;;  %v489_v45 = vadd.f32 %v488_v31, %v487_v19  ;;  %v451_v3 = vadd.f32 %v450_v46, %v449_v58  ;;  %v464_v10 = vrot.slane %v463_v60, 1 }
 0x236   :  { %v481_v42 = vrot.slane %v480_v24, 4  ;;  %v494_v56 = vsel %vm364_vm1, %v2819_v28, 0.0  ;;  %v476_v62 = vrot.slane %v475_v40, 2  ;;  %v470_v5 = vadd.f32 %v469_v59, %v468_v34 }
 0x237   :  { %v495_v61 = vrot.slane %v494_v56, 4  ;;  %v490_v38 = vrot.slane %v489_v45, 2  ;;  %v457_v13 = vrot.slane %v456_v63, 1  ;;  %2344 = vrcp.f32 %v451_v3 }
 0x238   :  { %v482_v2 = vadd.f32 %v481_v42, %v480_v24  ;;  %v477_v37 = vadd.f32 %v476_v62, %v475_v40  ;;  %v465_v16 = vadd.f32 %v464_v10, %v463_v60  ;;  %v471_v23 = vrot.slane %v470_v5, 1 }
 0x239   :  { %v496_v12 = vadd.f32 %v495_v61, %v494_v56  ;;  %v491_v48 = vadd.f32 %v490_v38, %v489_v45  ;;  %v458_v19 = vadd.f32 %v457_v13, %v456_v63 }
 0x23a   :  { %v483_v17 = vrot.slane %v482_v2, 2  ;;  %v478_v26 = vrot.slane %v477_v37, 1  ;;  %2346 = vrcp.f32 %v465_v16  ;;  %v472_v22 = vadd.f32 %v471_v23, %v470_v5 }
 0x23b   :  { %v497_v31 = vrot.slane %v496_v12, 2  ;;  %v492_v53 = vrot.slane %v491_v48, 1  ;;  %2348 = vrcp.f32 %v458_v19 }
 0x23c   :  { %v484_v47 = vadd.f32 %v483_v17, %v482_v2  ;;  %v479_v24 = vadd.f32 %v478_v26, %v477_v37  ;;  %2350 = vrcp.f32 %v472_v22 }
 0x23d   :  { %v498_v34 = vadd.f32 %v497_v31, %v496_v12  ;;  %v493_v35 = vadd.f32 %v492_v53, %v491_v48 }
 0x23e   :  { %v485_v58 = vrot.slane %v484_v47, 1  ;;  %2352 = vrcp.f32 %v479_v24 }
 0x23f   :  { %v499_v42 = vrot.slane %v498_v34, 1  ;;  %2354 = vrcp.f32 %v493_v35 }
 0x240   :  { %v486_v40 = vadd.f32 %v485_v58, %v484_v47 }
 0x241   :  { %v500_v45 = vadd.f32 %v499_v42, %v498_v34 }
 0x242   :  { %2356 = vrcp.f32 %v486_v40 }
 0x243   :  { %2358 = vrcp.f32 %v500_v45 }
 0x244   :  { %v2345_v56 = vpop.eup %2344 }
 0x245   :  { %v509_v60 = vmul.f32 %v2345_v56, %v2791_v1 }
 0x247   :  { %v2347_v46 = vpop.eup %2346 }
 0x248   :  { %v2349_v59 = vpop.eup %2348  ;;  %v511_v3 = vmul.f32 %v2347_v46, %v2795_v7 }
 0x249   :  { %v2351_v62 = vpop.eup %2350  ;;  %v510_v10 = vmul.f32 %v2349_v59, %v2797_v4 }
 0x24a   :  { %v512_v26 = vmul.f32 %v2351_v62, %v2801_v6 }
 0x24b   :  { %v2353_v5 = vpop.eup %2352 }
 0x24c   :  { %v2355_v23 = vpop.eup %2354  ;;  %v513_v19 = vmul.f32 %v2353_v5, %v2805_v9 }
 0x24d   :  { %v515_v45 = vmul.f32 %v2355_v23, %v2809_v18 }
 0x24f   :  { %v2357_v47 = vpop.eup %2356 }
 0x250   :  { %v514_v9 = vmul.f32 %v2357_v47, %v2813_v14  ;;  %v2359_v6 = vpop.eup %2358 }
 0x251   :  { %v516_v14 = vmul.f32 %v2359_v6, %v2819_v28 }
 0x27a   :  { %v526_v61 = vpop.permute.xlu1 %525 }
 0x27b   :  { %v549_v63 = vmul.f32 %v526_v61, %v509_v60 }
 0x27d   :  { %v557_v2 = vsel %vm364_vm1, %v549_v63, 0.0 }
 0x27e   :  { %v558_v38 = vrot.slane %v557_v2, 4  ;;  %v530_v12 = vpop.permute.xlu1 %529  ;;  %v528_v13 = vpop.permute.xlu0 %527 }
 0x27f   :  { %v551_v37 = vmul.f32 %v530_v12, %v511_v3  ;;  %v550_v17 = vmul.f32 %v528_v13, %v510_v10 }
 0x280   :  { %v559_v16 = vadd.f32 %v558_v38, %v557_v2 }
 0x281   :  { %v571_v1 = vsel %vm364_vm1, %v551_v37, 0.0  ;;  %v564_v48 = vsel %vm364_vm1, %v550_v17, 0.0 }
 0x282   :  { %v560_v7 = vrot.slane %v559_v16, 2  ;;  %v572_v31 = vrot.slane %v571_v1, 4  ;;  %v565_v4 = vrot.slane %v564_v48, 4  ;;  %v534_v22 = vpop.permute.xlu1 %533  ;;  %v532_v53 = vpop.permute.xlu0 %531 }
 0x283   :  { %v553_v24 = vmul.f32 %v534_v22, %v513_v19  ;;  %v552_v58 = vmul.f32 %v532_v53, %v512_v26 }
 0x284   :  { %v561_v34 = vadd.f32 %v560_v7, %v559_v16  ;;  %v573_v35 = vadd.f32 %v572_v31, %v571_v1  ;;  %v566_v40 = vadd.f32 %v565_v4, %v564_v48 }
 0x285   :  { %v585_v42 = vsel %vm364_vm1, %v553_v24, 0.0  ;;  %v578_v56 = vsel %vm364_vm1, %v552_v58, 0.0 }
 0x286   :  { %v574_v46 = vrot.slane %v573_v35, 2  ;;  %v567_v60 = vrot.slane %v566_v40, 2  ;;  %v586_v59 = vrot.slane %v585_v42, 4  ;;  %v579_v61 = vrot.slane %v578_v56, 4  ;;  %v538_v63 = vpop.permute.xlu1 %537  ;;  %v536_v62 = vpop.permute.xlu0 %535 }
 0x287   :  { %v555_v2 = vmul.f32 %v538_v63, %v515_v45  ;;  %v554_v3 = vmul.f32 %v536_v62, %v514_v9  ;;  %v562_v10 = vrot.slane %v561_v34, 1 }
 0x288   :  { %v575_v5 = vadd.f32 %v574_v46, %v573_v35  ;;  %v568_v38 = vadd.f32 %v567_v60, %v566_v40  ;;  %v587_v12 = vadd.f32 %v586_v59, %v585_v42  ;;  %v580_v13 = vadd.f32 %v579_v61, %v578_v56 }
 0x289   :  { %v599_v37 = vsel %vm364_vm1, %v555_v2, 0.0  ;;  %v592_v18 = vsel %vm364_vm1, %v554_v3, 0.0  ;;  %v563_v17 = vadd.f32 %v562_v10, %v561_v34 }
 0x28a   :  { %v588_v16 = vrot.slane %v587_v12, 2  ;;  %v581_v23 = vrot.slane %v580_v13, 2  ;;  %v600_v1 = vrot.slane %v599_v37, 4  ;;  %v593_v48 = vrot.slane %v592_v18, 4  ;;  %v540_v19 = vpop.permute.xlu0 %539 }
 0x28b   :  { %621 = vrot.lane.b32.xlu1 %v563_v17, %s2498_s25  ;;  %v556_v26 = vmul.f32 %v540_v19, %v516_v14  ;;  %v576_v47 = vrot.slane %v575_v5, 1  ;;  %v569_v7 = vrot.slane %v568_v38, 1 }
 0x28c   :  { %v589_v31 = vadd.f32 %v588_v16, %v587_v12  ;;  %v582_v4 = vadd.f32 %v581_v23, %v580_v13  ;;  %v601_v22 = vadd.f32 %v600_v1, %v599_v37  ;;  %v594_v53 = vadd.f32 %v593_v48, %v592_v18  ;;  %v2301_v12 = vld [vmem:[%s3345_s3] sm:$0xff]  }
 0x28d   :  { %v606_v24 = vsel %vm364_vm1, %v556_v26, 0.0  ;;  %v577_v58 = vadd.f32 %v576_v47, %v575_v5  ;;  %v570_v34 = vadd.f32 %v569_v7, %v568_v38  ;;  %v2300_v38 = vld [vmem:[%s3345_s3 + $0x8] sm:$0xff]  }
 0x28e   :  { %v602_v28 = vrot.slane %v601_v22, 2  ;;  %v595_v35 = vrot.slane %v594_v53, 2  ;;  %v607_v40 = vrot.slane %v606_v24, 4  ;;  %v590_v42 = vrot.slane %v589_v31, 1  ;;  %2228 = vmatprep.subr.bf16.mxu1 %v2300_v38 }
 0x28f   :  { %625 = vrot.lane.b32.xlu1 %v577_v58, %s2498_s25  ;;  %623 = vrot.lane.b32.xlu0 %v570_v34, %s2498_s25  ;;  %v583_v56 = vrot.slane %v582_v4, 1 }
 0x290   :  { %v603_v45 = vadd.f32 %v602_v28, %v601_v22  ;;  %v596_v9 = vadd.f32 %v595_v35, %v594_v53  ;;  %v608_v6 = vadd.f32 %v607_v40, %v606_v24  ;;  %v591_v46 = vadd.f32 %v590_v42, %v589_v31  ;;  %2229 = vmatpush3.bf16.msra.mxu1 %v2300_v38 }
 0x291   :  { %v584_v60 = vadd.f32 %v583_v56, %v582_v4  ;;  %2230 = vmatprep.subr.bf16.mxu1 %v2301_v12  ;;  %v2302_v56 = vld [vmem:[%s3345_s3 + $0x18] sm:$0xff]  }
 0x292   :  { %v609_v59 = vrot.slane %v608_v6, 2  ;;  %v604_v61 = vrot.slane %v603_v45, 1  ;;  %v597_v63 = vrot.slane %v596_v9, 1  ;;  %2240 = vmatprep.subr.bf16.mxu0 %v2302_v56 }
 0x293   :  { %629 = vrot.lane.b32.xlu1 %v591_v46, %s2498_s25  ;;  %627 = vrot.lane.b32.xlu0 %v584_v60, %s2498_s25 }
 0x294   :  { %v610_v62 = vadd.f32 %v609_v59, %v608_v6  ;;  %v605_v2 = vadd.f32 %v604_v61, %v603_v45  ;;  %v598_v3 = vadd.f32 %v597_v63, %v596_v9  ;;  %2231 = vmatpush3.bf16.msra.mxu1 %v2301_v12  ;;  %v2303_v45 = vld [vmem:[%s3345_s3 + $0x10] sm:$0xff]   ;;  %2241 = vmatpush3.bf16.msra.mxu0 %v2302_v56  ;;  %v2131_v9 = vld [vmem:[%s3342_s7 + $0x9] ss:$0 sm:$0xff] }
 0x295   :  { %2242 = vmatprep.subr.bf16.mxu0 %v2303_v45 }
 0x296   :  { %v611_v10 = vrot.slane %v610_v62, 1 }
 0x297   :  { %633 = vrot.lane.b32.xlu1 %v605_v2, %s2498_s25  ;;  %631 = vrot.lane.b32.xlu0 %v598_v3, %s2498_s25 }
 0x298   :  { %v612_v5 = vadd.f32 %v611_v10, %v610_v62  ;;  %2243 = vmatpush3.bf16.msra.mxu0 %v2303_v45 }
 0x29b   :  { %635 = vrot.lane.b32.xlu0 %v612_v5, %s2498_s25 }
 0x2fd   :  { %v622_v13 = vpop.permute.xlu1 %621 }
 0x2fe   :  { %v645_v17 = vmul.f32 %v622_v13, %v2699_v33 }
 0x301   :  { %v626_v37 = vpop.permute.xlu1 %625  ;;  %v624_v18 = vpop.permute.xlu0 %623 }
 0x302   :  { %v646_v14 = vmul.f32 %v624_v18, %v2704_v39  ;;  %v647_v48 = vmul.f32 %v626_v37, %v2702_v36 }
 0x304   :  { %v657_v16 = vpack.c.bf16 %v646_v14, %v645_v17 }
 0x305   :  { %v630_v23 = vpop.permute.xlu1 %629  ;;  %v628_v1 = vpop.permute.xlu0 %627 }
 0x306   :  { %v648_v19 = vmul.f32 %v628_v1, %v2710_v43  ;;  %669 = vrot.lane.b32.xlu1 %v657_v16, %s2498_s25  ;;  %v649_v7 = vmul.f32 %v630_v23, %v2712_v44 }
 0x308   :  { %v658_v26 = vpack.c.bf16 %v648_v19, %v647_v48 }
 0x309   :  { %v632_v47 = vpop.permute.xlu0 %631  ;;  %v634_v4 = vpop.permute.xlu1 %633 }
 0x30a   :  { %v650_v31 = vmul.f32 %v632_v47, %v2720_v51  ;;  %671 = vrot.lane.b32.xlu0 %v658_v26, %s2498_s25  ;;  %v651_v24 = vmul.f32 %v634_v4, %v2718_v50 }
 0x30c   :  { %v659_v22 = vpack.c.bf16 %v650_v31, %v649_v7 }
 0x30d   :  { %v636_v53 = vpop.permute.xlu0 %635 }
 0x30e   :  { %v652_v58 = vmul.f32 %v636_v53, %v2730_v54  ;;  %673 = vrot.lane.b32.xlu1 %v659_v22, %s2498_s25 }
 0x310   :  { %v660_v34 = vpack.c.bf16 %v652_v58, %v651_v24 }
 0x312   :  { %934 = vrot.lane.b32.xlu1 %v645_v17, %s2498_s25  ;;  %675 = vrot.lane.b32.xlu0 %v660_v34, %s2498_s25 }
 0x316   :  { %938 = vrot.lane.b32.xlu1 %v647_v48, %s2498_s25  ;;  %936 = vrot.lane.b32.xlu0 %v646_v14, %s2498_s25 }
 0x31a   :  { %942 = vrot.lane.b32.xlu1 %v649_v7, %s2498_s25  ;;  %940 = vrot.lane.b32.xlu0 %v648_v19, %s2498_s25 }
 0x31e   :  { %946 = vrot.lane.b32.xlu1 %v651_v24, %s2498_s25  ;;  %944 = vrot.lane.b32.xlu0 %v650_v31, %s2498_s25 }
 0x322   :  { %1132 = vrot.lane.b32.xlu1 %v2699_v33, %s2499_s30  ;;  %948 = vrot.lane.b32.xlu0 %v652_v58, %s2498_s25 }
 0x326   :  { %1136 = vrot.lane.b32.xlu1 %v2702_v36, %s2499_s30  ;;  %1134 = vrot.lane.b32.xlu0 %v2704_v39, %s2499_s30 }
 0x32a   :  { %1140 = vrot.lane.b32.xlu1 %v2712_v44, %s2499_s30  ;;  %1138 = vrot.lane.b32.xlu0 %v2710_v43, %s2499_s30 }
 0x32e   :  { %1144 = vrot.lane.b32.xlu1 %v2718_v50, %s2499_s30  ;;  %1142 = vrot.lane.b32.xlu0 %v2720_v51, %s2499_s30 }
 0x332   :  { %1146 = vrot.lane.b32.xlu0 %v2730_v54, %s2499_s30 }
 0x378   :  { %v670_v28 = vpop.permute.xlu1 %669 }
 0x379   :  { %2232 = vmatprep.mubr.msk.bf16.mxu1 %vm85_vm0, %v670_v28 }
 0x37c   :  { %v672_v35 = vpop.permute.xlu0 %671 }
 0x37d   :  { %2233 = vmatmul.mubr.msk.bf16.vlgmr.msra.gmra.mxu1 %vm85_vm0, %v672_v35 }
 0x380   :  { %v674_v40 = vpop.permute.xlu1 %673 }
 0x381   :  { %2236 = vmatprep.mubr.msk.bf16.mxu1 %vm85_vm0, %v674_v40 }
 0x384   :  { %v676_v42 = vpop.permute.xlu0 %675 }
 0x385   :  { %2237 = vmatmul.mubr.msk.bf16.gmra.mxu1 %vm85_vm0, %v676_v42 }
 0x43d   :  { %v2234_v6 = vpop.f32.mrf.mxu1 }
 0x43e   :  { %v744_v46 = vadd.f32 %v2234_v6, %v2131_v9 }
 0x43f   :  { %v735_v60 = vpop.f32.mrf.mxu1 }
 0x440   :  { %v768_v59 = vadd.f32 %v744_v46, %v2697_v32  ;;  %v736_v61 = vadd.f32 %v2131_v9, %v735_v60 }
 0x441   :  { %v2235_v63 = vpop.f32.mrf.mxu1 }
 0x442   :  { %v788_v62 = vsel %vm85_vm0, %v768_v59, -inf  ;;  %v766_v2 = vadd.f32 %v736_v61, %v2722_v52  ;;  %v747_v3 = vadd.f32 %v2235_v63, %v2131_v9 }
 0x443   :  { %v789_v10 = vrot.slane %v788_v62, 4  ;;  %v738_v5 = vpop.f32.mrf.mxu1 }
 0x444   :  { %v774_v38 = vsel %vm85_vm0, %v766_v2, -inf  ;;  %v2899_v12 = vadd.f32 %v747_v3, %v2706_v41  ;;  %v739_v13 = vadd.f32 %v2131_v9, %v738_v5 }
 0x445   :  { %v790_v37 = vmax.f32 %v788_v62, %v789_v10  ;;  %v775_v18 = vrot.slane %v774_v38, 4  ;;  %v2238_v17 = vpop.f32.mrf.mxu1 }
 0x446   :  { %v795_v32 = vsel %vm85_vm0, %v2899_v12, -inf  ;;  %v2904_v14 = vadd.f32 %v739_v13, %v2692_v27  ;;  %v760_v16 = vadd.f32 %v2238_v17, %v2131_v9 }
 0x447   :  { %v791_v52 = vrot.slane %v790_v37, 2  ;;  %v776_v23 = vmax.f32 %v774_v38, %v775_v18  ;;  %v796_v1 = vrot.slane %v795_v32, 4  ;;  %v751_v48 = vpop.f32.mrf.mxu1 }
 0x448   :  { %v781_v19 = vsel %vm85_vm0, %v2904_v14, -inf  ;;  %v2909_v41 = vadd.f32 %v760_v16, %v2751_v0  ;;  %v752_v26 = vadd.f32 %v2131_v9, %v751_v48 }
 0x449   :  { %v792_v47 = vmax.f32 %v790_v37, %v791_v52  ;;  %v777_v7 = vrot.slane %v776_v23, 2  ;;  %v797_v31 = vmax.f32 %v795_v32, %v796_v1  ;;  %v782_v4 = vrot.slane %v781_v19, 4  ;;  %v2239_v22 = vpop.f32.mrf.mxu1 }
 0x44a   :  { %v816_v27 = vsel %vm85_vm0, %v2909_v41, -inf  ;;  %v770_v53 = vadd.f32 %v752_v26, %v2716_v49  ;;  %v763_v24 = vadd.f32 %v2239_v22, %v2131_v9 }
 0x44b   :  { %v793_v58 = vrot.slane %v792_v47, 1  ;;  %v778_v34 = vmax.f32 %v776_v23, %v777_v7  ;;  %v798_v28 = vrot.slane %v797_v31, 2  ;;  %v783_v35 = vmax.f32 %v781_v19, %v782_v4  ;;  %v754_v40 = vpop.f32.mrf.mxu1 }
 0x44c   :  { %v817_v42 = vrot.slane %v816_v27, 4  ;;  %v802_v0 = vsel %vm85_vm0, %v770_v53, -inf  ;;  %v773_v56 = vadd.f32 %v763_v24, %v2771_v11  ;;  %v755_v45 = vadd.f32 %v2131_v9, %v754_v40 }
 0x44d   :  { %v794_v6 = vmax.f32 %v792_v47, %v793_v58  ;;  %v779_v46 = vrot.slane %v778_v34, 1  ;;  %v799_v60 = vmax.f32 %v797_v31, %v798_v28  ;;  %v784_v61 = vrot.slane %v783_v35, 2 }
 0x44e   :  { %v818_v63 = vmax.f32 %v816_v27, %v817_v42  ;;  %v803_v62 = vrot.slane %v802_v0, 4  ;;  %v823_v49 = vsel %vm85_vm0, %v773_v56, -inf  ;;  %v771_v3 = vadd.f32 %v755_v45, %v2732_v55 }
 0x44f   :  { %v832_v10 = vsub.f32 %v768_v59, %v794_v6  ;;  %v780_v5 = vmax.f32 %v778_v34, %v779_v46  ;;  %v800_v38 = vrot.slane %v799_v60, 1  ;;  %v785_v13 = vmax.f32 %v783_v35, %v784_v61 }
 0x450   :  { %v819_v37 = vrot.slane %v818_v63, 2  ;;  %v804_v18 = vmax.f32 %v802_v0, %v803_v62  ;;  %v824_v17 = vrot.slane %v823_v49, 4  ;;  %v809_v11 = vsel %vm85_vm0, %v771_v3, -inf }
 0x451   :  { %v842_v9 = vmul.f32 1.442695, %v832_v10  ;;  %v830_v32 = vsub.f32 %v766_v2, %v780_v5  ;;  %v801_v16 = vmax.f32 %v799_v60, %v800_v38  ;;  %v786_v52 = vrot.slane %v785_v13, 1 }
 0x452   :  { %v820_v23 = vmax.f32 %v818_v63, %v819_v37  ;;  %v805_v1 = vrot.slane %v804_v18, 2  ;;  %v825_v48 = vmax.f32 %v823_v49, %v824_v17  ;;  %v810_v19 = vrot.slane %v809_v11, 4 }
 0x453   :  { %2360 = vpow2.f32 %v842_v9  ;;  %v838_v26 = vmul.f32 1.442695, %v830_v32  ;;  %v833_v55 = vsub.f32 %v2899_v12, %v801_v16  ;;  %v787_v59 = vmax.f32 %v785_v13, %v786_v52 }
 0x454   :  { %v821_v47 = vrot.slane %v820_v23, 1  ;;  %v806_v7 = vmax.f32 %v804_v18, %v805_v1  ;;  %v826_v31 = vrot.slane %v825_v48, 2  ;;  %v811_v4 = vmax.f32 %v809_v11, %v810_v19 }
 0x455   :  { %2362 = vpow2.f32 %v838_v26  ;;  %v844_v22 = vmul.f32 1.442695, %v833_v55  ;;  %v831_v27 = vsub.f32 %v2904_v14, %v787_v59 }
 0x456   :  { %v822_v2 = vmax.f32 %v820_v23, %v821_v47  ;;  %v807_v24 = vrot.slane %v806_v7, 1  ;;  %v827_v58 = vmax.f32 %v825_v48, %v826_v31  ;;  %v812_v34 = vrot.slane %v811_v4, 2 }
 0x457   :  { %2364 = vpow2.f32 %v844_v22  ;;  %v840_v28 = vmul.f32 1.442695, %v831_v27 }
 0x458   :  { %v836_v35 = vsub.f32 %v2909_v41, %v822_v2  ;;  %v808_v40 = vmax.f32 %v806_v7, %v807_v24  ;;  %v828_v42 = vrot.slane %v827_v58, 1  ;;  %v813_v12 = vmax.f32 %v811_v4, %v812_v34 }
 0x459   :  { %2366 = vpow2.f32 %v840_v28 }
 0x45a   :  { %v850_v0 = vmul.f32 1.442695, %v836_v35  ;;  %v834_v45 = vsub.f32 %v770_v53, %v808_v40  ;;  %v829_v6 = vmax.f32 %v827_v58, %v828_v42  ;;  %v814_v46 = vrot.slane %v813_v12, 1 }
 0x45c   :  { %2368 = vpow2.f32 %v850_v0  ;;  %v846_v60 = vmul.f32 1.442695, %v834_v45  ;;  %v837_v61 = vsub.f32 %v773_v56, %v829_v6  ;;  %v815_v14 = vmax.f32 %v813_v12, %v814_v46 }
 0x45e   :  { %2370 = vpow2.f32 %v846_v60  ;;  %v852_v63 = vmul.f32 1.442695, %v837_v61  ;;  %v835_v62 = vsub.f32 %v771_v3, %v815_v14 }
 0x460   :  { %v2922_v49 = vpop.eup %2360  ;;  %2372 = vpow2.f32 %v852_v63  ;;  %v848_v10 = vmul.f32 1.442695, %v835_v62 }
 0x461   :  { %v868_v41 = vsel %vm85_vm0, %v2922_v49, 0.0 }
 0x462   :  { %v2926_v5 = vpop.eup %2362  ;;  %v869_v38 = vrot.slane %v868_v41, 4  ;;  %2374 = vpow2.f32 %v848_v10 }
 0x463   :  { %v854_v53 = vsel %vm85_vm0, %v2926_v5, 0.0 }
 0x464   :  { %v2930_v13 = vpop.eup %2364  ;;  %v870_v56 = vadd.f32 %v869_v38, %v868_v41  ;;  %v855_v37 = vrot.slane %v854_v53, 4 }
 0x465   :  { %v875_v3 = vsel %vm85_vm0, %v2930_v13, 0.0 }
 0x466   :  { %v2934_v18 = vpop.eup %2366  ;;  %v871_v17 = vrot.slane %v870_v56, 2  ;;  %v856_v11 = vadd.f32 %v855_v37, %v854_v53  ;;  %v876_v9 = vrot.slane %v875_v3, 4 }
 0x467   :  { %v861_v32 = vsel %vm85_vm0, %v2934_v18, 0.0 }
 0x468   :  { %v872_v16 = vadd.f32 %v871_v17, %v870_v56  ;;  %v857_v52 = vrot.slane %v856_v11, 2  ;;  %v877_v23 = vadd.f32 %v876_v9, %v875_v3  ;;  %v862_v1 = vrot.slane %v861_v32, 4  ;;  %v935_v9 = vpop.permute.xlu1 %934 }
 0x469   :  { %v2938_v48 = vpop.eup %2368 }
 0x46a   :  { %v873_v19 = vrot.slane %v872_v16, 1  ;;  %v858_v26 = vadd.f32 %v857_v52, %v856_v11  ;;  %v878_v55 = vrot.slane %v877_v23, 2  ;;  %v863_v59 = vadd.f32 %v862_v1, %v861_v32  ;;  %v937_v1 = vpop.permute.xlu0 %936 }
 0x46b   :  { %v2940_v47 = vpop.eup %2370  ;;  %v896_v7 = vsel %vm85_vm0, %v2938_v48, 0.0 }
 0x46c   :  { %v874_v31 = vadd.f32 %v873_v19, %v872_v16  ;;  %v859_v4 = vrot.slane %v858_v26, 1  ;;  %v879_v22 = vadd.f32 %v878_v55, %v877_v23  ;;  %v864_v27 = vrot.slane %v863_v59, 2 }
 0x46d   :  { %v2944_v2 = vpop.eup %2372  ;;  %v897_v24 = vrot.slane %v896_v7, 4  ;;  %v882_v58 = vsel %vm85_vm0, %v2940_v47, 0.0 }
 0x46e   :  { %2376 = vrcp.f32 %v874_v31  ;;  %v860_v34 = vadd.f32 %v859_v4, %v858_v26  ;;  %v880_v28 = vrot.slane %v879_v22, 1  ;;  %v865_v35 = vadd.f32 %v864_v27, %v863_v59 }
 0x46f   :  { %v2948_v40 = vpop.eup %2374  ;;  %v898_v42 = vadd.f32 %v897_v24, %v896_v7  ;;  %v883_v12 = vrot.slane %v882_v58, 4  ;;  %v903_v0 = vsel %vm85_vm0, %v2944_v2, 0.0 }
 0x470   :  { %2378 = vrcp.f32 %v860_v34  ;;  %v881_v45 = vadd.f32 %v880_v28, %v879_v22  ;;  %v866_v6 = vrot.slane %v865_v35, 1  ;;  %v904_v46 = vrot.slane %v903_v0, 4  ;;  %v939_v22 = vpop.permute.xlu1 %938  ;;  %v941_v34 = vpop.permute.xlu0 %940 }
 0x471   :  { %v899_v60 = vrot.slane %v898_v42, 2  ;;  %v884_v61 = vadd.f32 %v883_v12, %v882_v58  ;;  %v889_v14 = vsel %vm85_vm0, %v2948_v40, 0.0 }
 0x472   :  { %2380 = vrcp.f32 %v881_v45  ;;  %v867_v63 = vadd.f32 %v866_v6, %v865_v35  ;;  %v905_v62 = vadd.f32 %v904_v46, %v903_v0  ;;  %v890_v10 = vrot.slane %v889_v14, 4 }
 0x473   :  { %v900_v41 = vadd.f32 %v899_v60, %v898_v42  ;;  %v885_v38 = vrot.slane %v884_v61, 2 }
 0x474   :  { %2382 = vrcp.f32 %v867_v63  ;;  %v906_v53 = vrot.slane %v905_v62, 2  ;;  %v891_v56 = vadd.f32 %v890_v10, %v889_v14  ;;  %v943_v46 = vpop.permute.xlu1 %942  ;;  %v945_v63 = vpop.permute.xlu0 %944 }
 0x475   :  { %v901_v37 = vrot.slane %v900_v41, 1  ;;  %v886_v3 = vadd.f32 %v885_v38, %v884_v61 }
 0x476   :  { %v907_v17 = vadd.f32 %v906_v53, %v905_v62  ;;  %v892_v11 = vrot.slane %v891_v56, 2 }
 0x477   :  { %v902_v32 = vadd.f32 %v901_v37, %v900_v41  ;;  %v887_v16 = vrot.slane %v886_v3, 1 }
 0x478   :  { %v908_v52 = vrot.slane %v907_v17, 1  ;;  %v893_v23 = vadd.f32 %v892_v11, %v891_v56 }
 0x479   :  { %2384 = vrcp.f32 %v902_v32  ;;  %v888_v19 = vadd.f32 %v887_v16, %v886_v3 }
 0x47a   :  { %v909_v26 = vadd.f32 %v908_v52, %v907_v17  ;;  %v894_v55 = vrot.slane %v893_v23, 1 }
 0x47b   :  { %v2377_v59 = vpop.eup %2376  ;;  %2386 = vrcp.f32 %v888_v19 }
 0x47c   :  { %v920_v7 = vmul.f32 %v2377_v59, %v2922_v49  ;;  %2388 = vrcp.f32 %v909_v26  ;;  %v895_v31 = vadd.f32 %v894_v55, %v893_v23  ;;  %v949_v59 = vpop.permute.xlu0 %948 }
 0x47d   :  { %v2379_v4 = vpop.eup %2378 }
 0x47e   :  { %v960_v27 = vmul.f32 %v939_v22, %v920_v7  ;;  %v918_v24 = vmul.f32 %v2379_v4, %v2926_v5  ;;  %2390 = vrcp.f32 %v895_v31 }
 0x47f   :  { %v2381_v58 = vpop.eup %2380 }
 0x480   :  { %v980_v28 = vsel %vm85_vm0, %v960_v27, 0.0  ;;  %v921_v35 = vmul.f32 %v2381_v58, %v2930_v13  ;;  %v958_v42 = vmul.f32 %v935_v9, %v918_v24  ;;  %v947_v9 = vpop.permute.xlu1 %946 }
 0x481   :  { %v2383_v12 = vpop.eup %2382  ;;  %v981_v0 = vrot.slane %v980_v28, 4 }
 0x482   :  { %v961_v45 = vmul.f32 %v941_v34, %v921_v35  ;;  %v919_v49 = vmul.f32 %v2383_v12, %v2934_v18  ;;  %v966_v6 = vsel %vm85_vm0, %v958_v42, 0.0 }
 0x483   :  { %v982_v60 = vadd.f32 %v981_v0, %v980_v28  ;;  %v967_v61 = vrot.slane %v966_v6, 4 }
 0x484   :  { %v987_v5 = vsel %vm85_vm0, %v961_v45, 0.0  ;;  %v959_v14 = vmul.f32 %v937_v1, %v919_v49 }
 0x485   :  { %v988_v62 = vrot.slane %v987_v5, 4  ;;  %v968_v10 = vadd.f32 %v967_v61, %v966_v6  ;;  %v983_v41 = vrot.slane %v982_v60, 2 }
 0x486   :  { %v2385_v38 = vpop.eup %2384  ;;  %v973_v13 = vsel %vm85_vm0, %v959_v14, 0.0 }
 0x487   :  { %v989_v53 = vadd.f32 %v988_v62, %v987_v5  ;;  %v924_v56 = vmul.f32 %v2385_v38, %v2938_v48  ;;  %v969_v37 = vrot.slane %v968_v10, 2  ;;  %v974_v18 = vrot.slane %v973_v13, 4 }
 0x488   :  { %v2387_v3 = vpop.eup %2386  ;;  %v984_v17 = vadd.f32 %v983_v41, %v982_v60 }
 0x489   :  { %v2389_v11 = vpop.eup %2388  ;;  %v922_v32 = vmul.f32 %v2387_v3, %v2940_v47  ;;  %v970_v16 = vadd.f32 %v969_v37, %v968_v10  ;;  %v975_v52 = vadd.f32 %v974_v18, %v973_v13  ;;  %v990_v23 = vrot.slane %v989_v53, 2 }
 0x48a   :  { %v925_v1 = vmul.f32 %v2389_v11, %v2944_v2  ;;  %v985_v19 = vrot.slane %v984_v17, 1  ;;  %v964_v26 = vmul.f32 %v947_v9, %v924_v56 }
 0x48b   :  { %v2391_v55 = vpop.eup %2390  ;;  %v971_v7 = vrot.slane %v970_v16, 1  ;;  %v976_v31 = vrot.slane %v975_v52, 2  ;;  %v991_v48 = vadd.f32 %v990_v23, %v989_v53  ;;  %v962_v4 = vmul.f32 %v943_v46, %v922_v32 }
 0x48c   :  { %v923_v22 = vmul.f32 %v2391_v55, %v2948_v40  ;;  %v965_v27 = vmul.f32 %v949_v59, %v925_v1  ;;  %v1008_v24 = vsel %vm85_vm0, %v964_v26, 0.0  ;;  %v986_v28 = vadd.f32 %v985_v19, %v984_v17 }
 0x48d   :  { %v977_v58 = vadd.f32 %v976_v31, %v975_v52  ;;  %v992_v47 = vrot.slane %v991_v48, 1  ;;  %v994_v34 = vsel %vm85_vm0, %v962_v4, 0.0  ;;  %v1009_v42 = vrot.slane %v1008_v24, 4  ;;  %v1135_v4 = vpop.permute.xlu0 %1134 }
 0x48e   :  { %v963_v35 = vmul.f32 %v945_v63, %v923_v22  ;;  %v995_v2 = vrot.slane %v994_v34, 4  ;;  %v972_v12 = vadd.f32 %v971_v7, %v970_v16  ;;  %v1015_v49 = vsel %vm85_vm0, %v965_v27, 0.0  ;;  %v2142_v27 = vld [vmem:[%s3342_s7 + $0xc] ss:$0 sm:$0xff] }
 0x48f   :  { %v978_v0 = vrot.slane %v977_v58, 1  ;;  %v993_v45 = vadd.f32 %v992_v47, %v991_v48  ;;  %v1010_v40 = vadd.f32 %v1009_v42, %v1008_v24  ;;  %v1016_v60 = vrot.slane %v1015_v49, 4  ;;  %v1133_v48 = vpop.permute.xlu1 %1132 }
 0x490   :  { %v996_v6 = vadd.f32 %v995_v2, %v994_v34  ;;  %v1001_v46 = vsel %vm85_vm0, %v963_v35, 0.0  ;;  %v1022_v63 = vmul.f32 %v972_v12, %v2699_v33  ;;  %v1024_v53 = vmul.f32 %v986_v28, %v2702_v36 }
 0x491   :  { %v979_v61 = vadd.f32 %v978_v0, %v977_v58  ;;  %v1002_v5 = vrot.slane %v1001_v46, 4  ;;  %v1025_v14 = vmul.f32 %v993_v45, %v2710_v43  ;;  %v1011_v10 = vrot.slane %v1010_v40, 2  ;;  %v1139_v34 = vpop.permute.xlu0 %1138 }
 0x492   :  { %v997_v62 = vrot.slane %v996_v6, 2  ;;  %v1017_v41 = vadd.f32 %v1016_v60, %v1015_v49 }
 0x493   :  { %v1023_v38 = vmul.f32 %v979_v61, %v2704_v39  ;;  %v1003_v13 = vadd.f32 %v1002_v5, %v1001_v46  ;;  %v1012_v37 = vadd.f32 %v1011_v10, %v1010_v40  ;;  %v1036_v11 = vpack.c.bf16 %v1025_v14, %v1024_v53 }
 0x494   :  { %v998_v56 = vadd.f32 %v997_v62, %v996_v6  ;;  %v1018_v18 = vrot.slane %v1017_v41, 2 }
 0x495   :  { %v1035_v3 = vpack.c.bf16 %v1023_v38, %v1022_v63  ;;  %v1004_v17 = vrot.slane %v1003_v13, 2  ;;  %v1013_v32 = vrot.slane %v1012_v37, 1  ;;  %v1143_v60 = vpop.permute.xlu0 %1142 }
 0x496   :  { %v999_v9 = vrot.slane %v998_v56, 1  ;;  %v1019_v16 = vadd.f32 %v1018_v18, %v1017_v41 }
 0x497   :  { %2244 = vmatprep.mubr.msk.bf16.mxu0 %vm85_vm0, %v1035_v3  ;;  %v1005_v43 = vadd.f32 %v1004_v17, %v1003_v13  ;;  %v1014_v23 = vadd.f32 %v1013_v32, %v1012_v37 }
 0x498   :  { %2245 = vmatmul.mubr.msk.bf16.vlgmr.msra.gmra.mxu0 %vm85_vm0, %v1036_v11  ;;  %v1020_v33 = vrot.slane %v1019_v16, 1  ;;  %v1000_v52 = vadd.f32 %v999_v9, %v998_v56 }
 0x499   :  { %v1006_v39 = vrot.slane %v1005_v43, 1  ;;  %v1028_v59 = vmul.f32 %v1014_v23, %v2718_v50 }
 0x49a   :  { %v1021_v1 = vadd.f32 %v1020_v33, %v1019_v16  ;;  %v1026_v26 = vmul.f32 %v1000_v52, %v2712_v44  ;;  %v1137_v44 = vpop.permute.xlu1 %1136 }
 0x49b   :  { %v1007_v36 = vadd.f32 %v1006_v39, %v1005_v43 }
 0x49c   :  { %v1029_v19 = vmul.f32 %v1021_v1, %v2730_v54 }
 0x49d   :  { %v1027_v55 = vmul.f32 %v1007_v36, %v2720_v51 }
 0x49e   :  { %v1038_v31 = vpack.c.bf16 %v1029_v19, %v1028_v59  ;;  %v1141_v6 = vpop.permute.xlu1 %1140 }
 0x49f   :  { %v1037_v7 = vpack.c.bf16 %v1027_v55, %v1026_v26 }
 0x4a1   :  { %2248 = vmatprep.mubr.msk.bf16.mxu0 %vm85_vm0, %v1037_v7 }
 0x4a2   :  { %2249 = vmatmul.mubr.msk.bf16.gmra.mxu0 %vm85_vm0, %v1038_v31  ;;  %v1145_v38 = vpop.permute.xlu1 %1144 }
 0x558   :  { %v2246_v22 = vpop.f32.mrf.mxu0 }
 0x559   :  { %v1110_v58 = vadd.f32 %v2246_v22, %v2142_v27 }
 0x55a   :  { %v1101_v54 = vpop.f32.mrf.mxu0 }
 0x55b   :  { %v1102_v24 = vadd.f32 %v2142_v27, %v1101_v54  ;;  %v1158_v12 = vadd.f32 %v1137_v44, %v1110_v58 }
 0x55c   :  { %v2247_v51 = vpop.f32.mrf.mxu0 }
 0x55d   :  { %v1156_v47 = vadd.f32 %v1133_v48, %v1102_v24  ;;  %v1113_v50 = vadd.f32 %v2247_v51, %v2142_v27  ;;  %v1166_v5 = vadd.f32 %v1158_v12, %v2668_v30  ;;  %v1147_v30 = vpop.permute.xlu0 %1146 }
 0x55e   :  { %v1104_v28 = vpop.f32.mrf.mxu0 }
 0x55f   :  { %v1159_v35 = vadd.f32 %v1139_v34, %v1113_v50  ;;  %v1105_v2 = vadd.f32 %v2142_v27, %v1104_v28  ;;  %v1164_v42 = vadd.f32 %v1156_v47, %v2659_v29 }
 0x561   :  { %v1157_v0 = vadd.f32 %v1135_v4, %v1105_v2  ;;  %v1172_v45 = vsel %vm85_vm0, %v1164_v42, 0.0  ;;  %v1167_v49 = vadd.f32 %v1159_v35, %v2670_v15 }
 0x562   :  { %v2250_v46 = vpop.f32.mrf.mxu0  ;;  %1173 = vadd.xlane.f32.xlu1 %v1172_v45 }
 0x563   :  { %v1165_v40 = vadd.f32 %v1157_v0, %v2661_v8  ;;  %v1126_v14 = vadd.f32 %v2250_v46, %v2142_v27  ;;  %v1181_v29 = vsel %vm85_vm0, %v1167_v49, 0.0  ;;  %v1178_v8 = vsel %vm85_vm0, %v1166_v5, 0.0 }
 0x564   :  { %v1117_v61 = vpop.f32.mrf.mxu0 }
 0x565   :  { %v1118_v62 = vadd.f32 %v2142_v27, %v1117_v61  ;;  %v1175_v10 = vsel %vm85_vm0, %v1165_v40, 0.0  ;;  %v1162_v53 = vadd.f32 %v1145_v38, %v1126_v14  ;;  %v2305_v14 = vld [vmem:[%s3346_s4] sm:$0xff]  }
 0x566   :  { %v2251_v41 = vpop.f32.mrf.mxu0  ;;  %1176 = vadd.xlane.f32.xlu0 %v1175_v10  ;;  %1182 = vadd.xlane.f32.xlu1 %v1181_v29 }
 0x567   :  { %v1160_v63 = vadd.f32 %v1141_v6, %v1118_v62  ;;  %v1129_v15 = vadd.f32 %v2251_v41, %v2142_v27  ;;  %v1170_v9 = vadd.f32 %v1162_v53, %v2685_v57 }
 0x568   :  { %v1120_v13 = vpop.f32.mrf.mxu0 }
 0x569   :  { %v1121_v56 = vadd.f32 %v2142_v27, %v1120_v13  ;;  %v1168_v37 = vadd.f32 %v1160_v63, %v2677_v20  ;;  %v1163_v18 = vadd.f32 %v1147_v30, %v1129_v15  ;;  %v1190_v43 = vsel %vm85_vm0, %v1170_v9, 0.0 }
 0x56a   :  { %1179 = vadd.xlane.f32.xlu0 %v1178_v8 }
 0x56b   :  { %v1161_v3 = vadd.f32 %v1143_v60, %v1121_v56  ;;  %v1184_v17 = vsel %vm85_vm0, %v1168_v37, 0.0  ;;  %v1171_v16 = vadd.f32 %v1163_v18, %v2687_v25 }
 0x56d   :  { %v1169_v11 = vadd.f32 %v1161_v3, %v2679_v21  ;;  %v1193_v20 = vsel %vm85_vm0, %v1171_v16, 0.0 }
 0x56e   :  { %1185 = vadd.xlane.f32.xlu0 %v1184_v17 }
 0x56f   :  { %v1187_v32 = vsel %vm85_vm0, %v1169_v11, 0.0 }
 0x570   :  { %1188 = vadd.xlane.f32.xlu1 %v1187_v32 }
 0x572   :  { %1191 = vadd.xlane.f32.xlu0 %v1190_v43 }
 0x574   :  { %1194 = vadd.xlane.f32.xlu1 %v1193_v20 }
 0x5eb   :  { %v1174_v33 = vpop.xlane.xlu1 %1173 }
 0x5ec   :  { %v1196_v52 = vmul.f32 0.03125, %v1174_v33 }
 0x5ee   :  { %v3001_v39 = vsub.f32 %v1164_v42, %v1196_v52 }
 0x5ef   :  { %v1183_v23 = vpop.xlane.xlu1 %1182  ;;  %v1177_v21 = vpop.xlane.xlu0 %1176 }
 0x5f0   :  { %v1199_v1 = vmul.f32 0.03125, %v1183_v23  ;;  %v1197_v57 = vmul.f32 0.03125, %v1177_v21  ;;  %v1212_v36 = vmul.f32 %v3001_v39, %v3001_v39  ;;  %v2149_v21 = vld [vmem:[%s3342_s7 + $0xd] ss:$0 sm:$0xff] }
 0x5f2   :  { %v3005_v19 = vsub.f32 %v1167_v49, %v1199_v1  ;;  %v3007_v25 = vsub.f32 %v1165_v40, %v1197_v57  ;;  %v1220_v26 = vsel %vm85_vm0, %v1212_v36, 0.0 }
 0x5f3   :  { %1221 = vadd.xlane.f32.xlu0 %v1220_v26  ;;  %v1180_v55 = vpop.xlane.xlu0 %1179 }
 0x5f4   :  { %v1198_v59 = vmul.f32 0.03125, %v1180_v55  ;;  %v1213_v7 = vmul.f32 %v3007_v25, %v3007_v25  ;;  %v1215_v4 = vmul.f32 %v3005_v19, %v3005_v19  ;;  %v2150_v55 = vld [vmem:[%s3342_s7 + $0xe] ss:$0 sm:$0xff] }
 0x5f6   :  { %v3012_v31 = vsub.f32 %v1166_v5, %v1198_v59  ;;  %v1223_v48 = vsel %vm85_vm0, %v1213_v7, 0.0  ;;  %v1229_v51 = vsel %vm85_vm0, %v1215_v4, 0.0  ;;  %v2304_v5 = vld [vmem:[%s3346_s4 + $0x8] sm:$0xff]  }
 0x5f7   :  { %1224 = vadd.xlane.f32.xlu1 %v1223_v48  ;;  %v1186_v22 = vpop.xlane.xlu0 %1185  ;;  %2252 = vmatprep.subr.bf16.mxu1 %v2304_v5 }
 0x5f8   :  { %v1200_v27 = vmul.f32 0.03125, %v1186_v22  ;;  %v1214_v54 = vmul.f32 %v3012_v31, %v3012_v31  ;;  %2253 = vmatpush3.bf16.msra.mxu1 %v2304_v5 }
 0x5f9   :  { %v1189_v24 = vpop.xlane.xlu1 %1188  ;;  %2254 = vmatprep.subr.bf16.mxu1 %v2305_v14 }
 0x5fa   :  { %v1201_v44 = vmul.f32 0.03125, %v1189_v24  ;;  %v3019_v58 = vsub.f32 %v1168_v37, %v1200_v27  ;;  %v1226_v47 = vsel %vm85_vm0, %v1214_v54, 0.0 }
 0x5fb   :  { %1230 = vadd.xlane.f32.xlu1 %v1229_v51  ;;  %1227 = vadd.xlane.f32.xlu0 %v1226_v47  ;;  %v1192_v50 = vpop.xlane.xlu0 %1191 }
 0x5fc   :  { %v3023_v34 = vsub.f32 %v1169_v11, %v1201_v44  ;;  %v1202_v28 = vmul.f32 0.03125, %v1192_v50  ;;  %v1216_v35 = vmul.f32 %v3019_v58, %v3019_v58  ;;  %2255 = vmatpush3.bf16.msra.mxu1 %v2305_v14  ;;  %v2307_v14 = vld [vmem:[%s3347_s5 + $0x10] sm:$0xff]  }
 0x5fd   :  { %v1195_v2 = vpop.xlane.xlu1 %1194 }
 0x5fe   :  { %v1203_v42 = vmul.f32 0.03125, %v1195_v2  ;;  %v3027_v12 = vsub.f32 %v1170_v9, %v1202_v28  ;;  %v1217_v0 = vmul.f32 %v3023_v34, %v3023_v34  ;;  %v1232_v45 = vsel %vm85_vm0, %v1216_v35, 0.0 }
 0x5ff   :  { %1233 = vadd.xlane.f32.xlu0 %v1232_v45 }
 0x600   :  { %v3032_v49 = vsub.f32 %v1171_v16, %v1203_v42  ;;  %v1235_v6 = vsel %vm85_vm0, %v1217_v0, 0.0  ;;  %v1218_v46 = vmul.f32 %v3027_v12, %v3027_v12 }
 0x601   :  { %1236 = vadd.xlane.f32.xlu1 %v1235_v6 }
 0x602   :  { %v1219_v40 = vmul.f32 %v3032_v49, %v3032_v49  ;;  %v1238_v60 = vsel %vm85_vm0, %v1218_v46, 0.0 }
 0x603   :  { %1239 = vadd.xlane.f32.xlu0 %v1238_v60 }
 0x604   :  { %v1241_v61 = vsel %vm85_vm0, %v1219_v40, 0.0 }
 0x605   :  { %1242 = vadd.xlane.f32.xlu1 %v1241_v61 }
 0x67c   :  { %v1222_v62 = vpop.xlane.xlu0 %1221 }
 0x67d   :  { %v1244_v10 = vmul.f32 0.03125, %v1222_v62  ;;  %v2308_v62 = vld [vmem:[%s3347_s5 + $0x8] sm:$0xff]  }
 0x67f   :  { %v1252_v29 = vadd.f32 1e-12, %v1244_v10  ;;  %v2309_v10 = vld [vmem:[%s3347_s5] sm:$0xff]  }
 0x680   :  { %v1225_v41 = vpop.xlane.xlu1 %1224 }
 0x681   :  { %2392 = vrsqrt.f32 %v1252_v29  ;;  %v1245_v63 = vmul.f32 0.03125, %v1225_v41  ;;  %v2151_v29 = vld [vmem:[%s3342_s7 + $0xf] ss:$0 sm:$0xff] }
 0x683   :  { %v1253_v15 = vadd.f32 1e-12, %v1245_v63 }
 0x684   :  { %v1231_v38 = vpop.xlane.xlu1 %1230  ;;  %v1228_v13 = vpop.xlane.xlu0 %1227 }
 0x685   :  { %2394 = vrsqrt.f32 %v1253_v15  ;;  %v1247_v53 = vmul.f32 0.03125, %v1231_v38  ;;  %v1246_v56 = vmul.f32 0.03125, %v1228_v13 }
 0x687   :  { %v1255_v8 = vadd.f32 1e-12, %v1247_v53  ;;  %v1254_v37 = vadd.f32 1e-12, %v1246_v56 }
 0x688   :  { %v1234_v30 = vpop.xlane.xlu0 %1233 }
 0x689   :  { %2396 = vrsqrt.f32 %v1255_v8  ;;  %v1248_v18 = vmul.f32 0.03125, %v1234_v30 }
 0x68a   :  { %2398 = vrsqrt.f32 %v1254_v37  ;;  %v1237_v3 = vpop.xlane.xlu1 %1236 }
 0x68b   :  { %v1249_v17 = vmul.f32 0.03125, %v1237_v3  ;;  %v1256_v11 = vadd.f32 1e-12, %v1248_v18 }
 0x68c   :  { %v1240_v9 = vpop.xlane.xlu0 %1239 }
 0x68d   :  { %v1257_v32 = vadd.f32 1e-12, %v1249_v17  ;;  %2400 = vrsqrt.f32 %v1256_v11  ;;  %v1250_v16 = vmul.f32 0.03125, %v1240_v9 }
 0x68e   :  { %v2393_v43 = vpop.eup %2392  ;;  %v1243_v20 = vpop.xlane.xlu1 %1242 }
 0x68f   :  { %2402 = vrsqrt.f32 %v1257_v32  ;;  %v1251_v33 = vmul.f32 0.03125, %v1243_v20  ;;  %v1258_v52 = vadd.f32 1e-12, %v1250_v16  ;;  %v1268_v23 = vmul.f32 %v2393_v43, %v3001_v39 }
 0x691   :  { %v1259_v1 = vadd.f32 1e-12, %v1251_v33  ;;  %2404 = vrsqrt.f32 %v1258_v52  ;;  %v1280_v26 = vmul.f32 %v2149_v21, %v1268_v23 }
 0x692   :  { %v2395_v57 = vpop.eup %2394 }
 0x693   :  { %2406 = vrsqrt.f32 %v1259_v1  ;;  %v1269_v36 = vmul.f32 %v2395_v57, %v3007_v25  ;;  %v3056_v4 = vadd.f32 %v2150_v55, %v1280_v26 }
 0x695   :  { %v1281_v59 = vmul.f32 %v2149_v21, %v1269_v36 }
 0x696   :  { %v2397_v7 = vpop.eup %2396 }
 0x697   :  { %v2399_v48 = vpop.eup %2398  ;;  %v1271_v39 = vmul.f32 %v2397_v7, %v3005_v19  ;;  %v3058_v22 = vadd.f32 %v2150_v55, %v1281_v59 }
 0x698   :  { %v1270_v27 = vmul.f32 %v2399_v48, %v3012_v31 }
 0x699   :  { %v1283_v54 = vmul.f32 %v2149_v21, %v1271_v39  ;;  %v1304_v25 = vpack.c.bf16 %v3058_v22, %v3056_v4 }
 0x69a   :  { %v2401_v24 = vpop.eup %2400  ;;  %v1282_v44 = vmul.f32 %v2149_v21, %v1270_v27 }
 0x69b   :  { %2256 = vmatprep.mubr.msk.bf16.mxu1 %vm85_vm0, %v1304_v25  ;;  %v3064_v51 = vadd.f32 %v2150_v55, %v1283_v54  ;;  %v1272_v47 = vmul.f32 %v2401_v24, %v3019_v58 }
 0x69c   :  { %v2403_v50 = vpop.eup %2402  ;;  %v3067_v19 = vadd.f32 %v2150_v55, %v1282_v44 }
 0x69d   :  { %v1273_v28 = vmul.f32 %v2403_v50, %v3023_v34  ;;  %v1284_v35 = vmul.f32 %v2149_v21, %v1272_v47 }
 0x69e   :  { %v2405_v2 = vpop.eup %2404  ;;  %v1305_v31 = vpack.c.bf16 %v3064_v51, %v3067_v19 }
 0x69f   :  { %v1285_v42 = vmul.f32 %v2149_v21, %v1273_v28  ;;  %v3072_v0 = vadd.f32 %v2150_v55, %v1284_v35  ;;  %v1274_v45 = vmul.f32 %v2405_v2, %v3027_v12 }
 0x6a0   :  { %v2407_v6 = vpop.eup %2406  ;;  %2257 = vmatmul.mubr.msk.bf16.vlgmr.msra.gmra.mxu1 %vm85_vm0, %v1305_v31 }
 0x6a1   :  { %v3076_v46 = vadd.f32 %v2150_v55, %v1285_v42  ;;  %v1275_v58 = vmul.f32 %v2407_v6, %v3032_v49  ;;  %v1286_v40 = vmul.f32 %v2149_v21, %v1274_v45  ;;  %v2306_v49 = vld [vmem:[%s3347_s5 + $0x18] sm:$0xff]  }
 0x6a2   :  { %2264 = vmatprep.subr.bf16.mxu0 %v2306_v49 }
 0x6a3   :  { %v1306_v34 = vpack.c.bf16 %v3076_v46, %v3072_v0  ;;  %v1287_v60 = vmul.f32 %v2149_v21, %v1275_v58  ;;  %v3081_v61 = vadd.f32 %v2150_v55, %v1286_v40  ;;  %2265 = vmatpush3.bf16.msra.mxu0 %v2306_v49 }
 0x6a4   :  { %2266 = vmatprep.subr.bf16.mxu0 %v2307_v14 }
 0x6a5   :  { %2260 = vmatprep.mubr.msk.bf16.mxu1 %vm85_vm0, %v1306_v34  ;;  %v3084_v5 = vadd.f32 %v2150_v55, %v1287_v60 }
 0x6a7   :  { %v1307_v12 = vpack.c.bf16 %v3084_v5, %v3081_v61  ;;  %2267 = vmatpush3.bf16.msra.mxu0 %v2307_v14 }
 0x6a8   :  { %2268 = vmatprep.subr.bf16.mxu0 %v2308_v62 }
 0x6a9   :  { %2261 = vmatmul.mubr.msk.bf16.gmra.mxu1 %vm85_vm0, %v1307_v12 }
 0x6ab   :  { %2269 = vmatpush3.bf16.msra.mxu0 %v2308_v62 }
 0x6ac   :  { %2270 = vmatprep.subr.bf16.mxu0 %v2309_v10 }
 0x6af   :  { %2271 = vmatpush3.bf16.msra.mxu0 %v2309_v10 }
 0x760   :  { %v2258_v41 = vpop.f32.mrf.mxu1 }
 0x761   :  { %v3104_v63 = vadd.f32 %v2258_v41, %v2151_v29 }
 0x762   :  { %v1370_v15 = vpop.f32.mrf.mxu1 }
 0x763   :  { %v1411_v38 = vmul.f32 0.044715, %v3104_v63  ;;  %v3107_v13 = vadd.f32 %v2151_v29, %v1370_v15 }
 0x764   :  { %v2259_v53 = vpop.f32.mrf.mxu1 }
 0x765   :  { %v1419_v56 = vmul.f32 %v1411_v38, %v3104_v63  ;;  %v1409_v8 = vmul.f32 0.044715, %v3107_v13  ;;  %v1382_v37 = vadd.f32 %v2259_v53, %v2151_v29 }
 0x766   :  { %v1373_v30 = vpop.f32.mrf.mxu1 }
 0x767   :  { %v1427_v18 = vmul.f32 %v1419_v56, %v3104_v63  ;;  %v1417_v3 = vmul.f32 %v1409_v8, %v3107_v13  ;;  %v1412_v17 = vmul.f32 0.044715, %v1382_v37  ;;  %v1374_v11 = vadd.f32 %v2151_v29, %v1373_v30 }
 0x769   :  { %v1435_v9 = vadd.f32 %v1427_v18, %v3104_v63  ;;  %v1425_v32 = vmul.f32 %v1417_v3, %v3107_v13  ;;  %v1420_v16 = vmul.f32 %v1412_v17, %v1382_v37  ;;  %v2262_v43 = vpop.f32.mrf.mxu1  ;;  %v1410_v20 = vmul.f32 0.044715, %v1374_v11 }
 0x76a   :  { %v3115_v33 = vadd.f32 %v2262_v43, %v2151_v29  ;;  %v1404_v18 = vmul.f32 0.5, %v1382_v37  ;;  %v1401_v3 = vmul.f32 0.5, %v3107_v13  ;;  %v1402_v17 = vmul.f32 0.5, %v1374_v11 }
 0x76b   :  { %v1443_v52 = vmul.f32 0.7978846, %v1435_v9  ;;  %v1433_v23 = vadd.f32 %v1425_v32, %v3107_v13  ;;  %v1428_v21 = vmul.f32 %v1420_v16, %v1382_v37  ;;  %v1386_v1 = vpop.f32.mrf.mxu1  ;;  %v1418_v57 = vmul.f32 %v1410_v20, %v1374_v11 }
 0x76c   :  { %v1415_v36 = vmul.f32 0.044715, %v3115_v33  ;;  %v3119_v26 = vadd.f32 %v2151_v29, %v1386_v1  ;;  %v1403_v32 = vmul.f32 0.5, %v3104_v63 }
 0x76d   :  { %2408 = vtanh.f32 %v1443_v52  ;;  %v1441_v55 = vmul.f32 0.7978846, %v1433_v23  ;;  %v1436_v59 = vadd.f32 %v1428_v21, %v1382_v37  ;;  %v2263_v7 = vpop.f32.mrf.mxu1  ;;  %v1426_v48 = vmul.f32 %v1418_v57, %v1374_v11 }
 0x76e   :  { %v1423_v39 = vmul.f32 %v1415_v36, %v3115_v33  ;;  %v1413_v27 = vmul.f32 0.044715, %v3119_v26  ;;  %v1398_v54 = vadd.f32 %v2263_v7, %v2151_v29  ;;  %v1405_v63 = vmul.f32 0.5, %v3119_v26 }
 0x76f   :  { %2410 = vtanh.f32 %v1441_v55  ;;  %v1444_v25 = vmul.f32 0.7978846, %v1436_v59  ;;  %v1389_v24 = vpop.f32.mrf.mxu1  ;;  %v1434_v44 = vadd.f32 %v1426_v48, %v1374_v11 }
 0x770   :  { %v1431_v47 = vmul.f32 %v1423_v39, %v3115_v33  ;;  %v1421_v50 = vmul.f32 %v1413_v27, %v3119_v26  ;;  %v1416_v28 = vmul.f32 0.044715, %v1398_v54  ;;  %v1390_v35 = vadd.f32 %v2151_v29, %v1389_v24 }
 0x771   :  { %2412 = vtanh.f32 %v1444_v25  ;;  %v1442_v2 = vmul.f32 0.7978846, %v1434_v44  ;;  %v1408_v11 = vmul.f32 0.5, %v1398_v54  ;;  %v1407_v39 = vmul.f32 0.5, %v3115_v33 }
 0x772   :  { %v1439_v31 = vadd.f32 %v1431_v47, %v3115_v33  ;;  %v1429_v42 = vmul.f32 %v1421_v50, %v3119_v26  ;;  %v1424_v45 = vmul.f32 %v1416_v28, %v1398_v54  ;;  %v1414_v6 = vmul.f32 0.044715, %v1390_v35 }
 0x773   :  { %2414 = vtanh.f32 %v1442_v2  ;;  %v1406_v7 = vmul.f32 0.5, %v1390_v35 }
 0x774   :  { %v1447_v58 = vmul.f32 0.7978846, %v1439_v31  ;;  %v1437_v40 = vadd.f32 %v1429_v42, %v3119_v26  ;;  %v1432_v34 = vmul.f32 %v1424_v45, %v1398_v54  ;;  %v1422_v60 = vmul.f32 %v1414_v6, %v1390_v35 }
 0x776   :  { %v1445_v12 = vmul.f32 0.7978846, %v1437_v40  ;;  %v1440_v49 = vadd.f32 %v1432_v34, %v1398_v54  ;;  %v1430_v14 = vmul.f32 %v1422_v60, %v1390_v35  ;;  %2416 = vtanh.f32 %v1447_v58  ;;  %v2158_v54 = vld [vmem:[%s3342_s7 + $0x10] ss:$0 sm:$0xff] }
 0x778   :  { %v1448_v62 = vmul.f32 0.7978846, %v1440_v49  ;;  %2418 = vtanh.f32 %v1445_v12  ;;  %v1438_v10 = vadd.f32 %v1430_v14, %v1390_v35 }
 0x77a   :  { %v2409_v29 = vpop.eup %2408  ;;  %2420 = vtanh.f32 %v1448_v62  ;;  %v1446_v41 = vmul.f32 0.7978846, %v1438_v10 }
 0x77b   :  { %v1459_v30 = vadd.f32 1.0, %v2409_v29 }
 0x77c   :  { %v2411_v15 = vpop.eup %2410  ;;  %2422 = vtanh.f32 %v1446_v41 }
 0x77d   :  { %v1457_v56 = vadd.f32 1.0, %v2411_v15  ;;  %v1467_v23 = vmul.f32 %v1459_v30, %v1403_v32 }
 0x77e   :  { %v2413_v38 = vpop.eup %2412 }
 0x77f   :  { %v1460_v53 = vadd.f32 1.0, %v2413_v38  ;;  %v1465_v43 = vmul.f32 %v1457_v56, %v1401_v3 }
 0x780   :  { %v2415_v8 = vpop.eup %2414 }
 0x781   :  { %v1458_v9 = vadd.f32 1.0, %v2415_v8  ;;  %v1468_v16 = vmul.f32 %v1460_v53, %v1404_v18 }
 0x783   :  { %v1466_v20 = vmul.f32 %v1458_v9, %v1402_v17  ;;  %v2417_v52 = vpop.eup %2416  ;;  %v1482_v36 = vpack.c.bf16 %v1468_v16, %v1467_v23 }
 0x784   :  { %v1463_v59 = vadd.f32 1.0, %v2417_v52 }
 0x785   :  { %v2419_v21 = vpop.eup %2418  ;;  %v1481_v1 = vpack.c.bf16 %v1466_v20, %v1465_v43 }
 0x786   :  { %v1461_v13 = vadd.f32 1.0, %v2419_v21  ;;  %v1471_v44 = vmul.f32 %v1463_v59, %v1407_v39 }
 0x787   :  { %v2421_v57 = vpop.eup %2420  ;;  %2272 = vmatprep.mubr.msk.bf16.mxu0 %vm1513_vm2, %v1481_v1 }
 0x788   :  { %v1464_v55 = vadd.f32 1.0, %v2421_v57  ;;  %2273 = vmatmul.mubr.msk.bf16.vlgmr.msra.gmra.mxu0 %vm1513_vm2, %v1482_v36  ;;  %v1469_v25 = vmul.f32 %v1461_v13, %v1405_v63 }
 0x789   :  { %v2423_v37 = vpop.eup %2422 }
 0x78a   :  { %v1462_v48 = vadd.f32 1.0, %v2423_v37  ;;  %v1472_v27 = vmul.f32 %v1464_v55, %v1408_v11 }
 0x78c   :  { %v1470_v24 = vmul.f32 %v1462_v48, %v1406_v7  ;;  %v1484_v50 = vpack.c.bf16 %v1472_v27, %v1471_v44 }
 0x78e   :  { %v1483_v47 = vpack.c.bf16 %v1470_v24, %v1469_v25 }
 0x790   :  { %2276 = vmatprep.mubr.msk.bf16.mxu0 %vm1513_vm2, %v1483_v47 }
 0x791   :  { %2277 = vmatmul.mubr.msk.bf16.gmra.mxu0 %vm1513_vm2, %v1484_v50 }
 0x848   :  { %v2274_v28 = vpop.f32.mrf.mxu0 }
 0x849   :  { %v1569_v35 = vadd.f32 %v2274_v28, %v2158_v54 }
 0x84a   :  { %v1560_v26 = vpop.f32.mrf.mxu0 }
 0x84b   :  { %v1561_v2 = vadd.f32 %v2158_v54, %v1560_v26  ;;  %v1593_v40 = vadd.f32 %v1569_v35, %v3067_v19 }
 0x84c   :  { %v2275_v31 = vpop.f32.mrf.mxu0 }
 0x84d   :  { %v1591_v33 = vadd.f32 %v1561_v2, %v3056_v4  ;;  %v1572_v45 = vadd.f32 %v2275_v31, %v2158_v54  ;;  %v1605_v14 = vsel %vm85_vm0, %v1593_v40, 0.0 }
 0x84e   :  { %v1563_v42 = vpop.f32.mrf.mxu0 }
 0x84f   :  { %v1564_v6 = vadd.f32 %v2158_v54, %v1563_v42  ;;  %v1599_v58 = vsel %vm85_vm0, %v1591_v33, 0.0  ;;  %v1594_v62 = vadd.f32 %v1572_v45, %v3064_v51 }
 0x850   :  { %1600 = vadd.xlane.f32.xlu0 %v1599_v58  ;;  %v2311_v58 = vld [vmem:[%s3348_s6] sm:$0xff]  }
 0x851   :  { %v2278_v34 = vpop.f32.mrf.mxu0  ;;  %v1592_v60 = vadd.f32 %v1564_v6, %v3058_v22  ;;  %v1608_v19 = vsel %vm85_vm0, %v1594_v62, 0.0  ;;  %v2310_v6 = vld [vmem:[%s3348_s6 + $0x8] sm:$0xff]  }
 0x852   :  { %v1585_v10 = vadd.f32 %v2278_v34, %v2158_v54  ;;  %2280 = vmatprep.subr.bf16.mxu1 %v2310_v6 }
 0x853   :  { %v1576_v12 = vpop.f32.mrf.mxu0  ;;  %v1602_v49 = vsel %vm85_vm0, %v1592_v60, 0.0  ;;  %2281 = vmatpush3.bf16.msra.mxu1 %v2310_v6 }
 0x854   :  { %v1577_v4 = vadd.f32 %v2158_v54, %v1576_v12  ;;  %1603 = vadd.xlane.f32.xlu1 %v1602_v49  ;;  %1606 = vadd.xlane.f32.xlu0 %v1605_v14  ;;  %v1597_v56 = vadd.f32 %v1585_v10, %v3081_v61 }
 0x855   :  { %v2279_v29 = vpop.f32.mrf.mxu0  ;;  %2282 = vmatprep.subr.bf16.mxu1 %v2311_v58 }
 0x856   :  { %v1595_v41 = vadd.f32 %v1577_v4, %v3072_v0  ;;  %v1588_v38 = vadd.f32 %v2279_v29, %v2158_v54  ;;  %v1617_v30 = vsel %vm85_vm0, %v1597_v56, 0.0 }
 0x857   :  { %v1579_v15 = vpop.f32.mrf.mxu0  ;;  %2283 = vmatpush3.bf16.msra.mxu1 %v2311_v58 }
 0x858   :  { %v1580_v53 = vadd.f32 %v2158_v54, %v1579_v15  ;;  %1609 = vadd.xlane.f32.xlu1 %v1608_v19  ;;  %v1611_v22 = vsel %vm85_vm0, %v1595_v41, 0.0  ;;  %v1598_v18 = vadd.f32 %v1588_v38, %v3084_v5 }
 0x859   :  { %1612 = vadd.xlane.f32.xlu0 %v1611_v22 }
 0x85a   :  { %v1596_v51 = vadd.f32 %v1580_v53, %v3076_v46  ;;  %v1620_v0 = vsel %vm85_vm0, %v1598_v18, 0.0 }
 0x85c   :  { %v1614_v8 = vsel %vm85_vm0, %v1596_v51, 0.0 }
 0x85d   :  { %1615 = vadd.xlane.f32.xlu1 %v1614_v8  ;;  %1618 = vadd.xlane.f32.xlu0 %v1617_v30 }
 0x861   :  { %1621 = vadd.xlane.f32.xlu1 %v1620_v0 }
 0x8d9   :  { %v1601_v3 = vpop.xlane.xlu0 %1600 }
 0x8da   :  { %v1623_v17 = vmul.f32 0.03125, %v1601_v3 }
 0x8dc   :  { %v3155_v9 = vsub.f32 %v1591_v33, %v1623_v17 }
 0x8dd   :  { %v1604_v32 = vpop.xlane.xlu1 %1603  ;;  %v1607_v61 = vpop.xlane.xlu0 %1606 }
 0x8de   :  { %v1624_v16 = vmul.f32 0.03125, %v1604_v32  ;;  %v1625_v43 = vmul.f32 0.03125, %v1607_v61  ;;  %v1639_v46 = vmul.f32 %v3155_v9, %v3155_v9  ;;  %v2167_v61 = vld [vmem:[%s3342_s7 + $0x11] ss:$0 sm:$0xff] }
 0x8e0   :  { %v3159_v20 = vsub.f32 %v1592_v60, %v1624_v16  ;;  %v3161_v52 = vsub.f32 %v1593_v40, %v1625_v43  ;;  %v1647_v5 = vsel %vm85_vm0, %v1639_v46, 0.0 }
 0x8e1   :  { %v1610_v23 = vpop.xlane.xlu1 %1609  ;;  %1648 = vadd.xlane.f32.xlu0 %v1647_v5 }
 0x8e2   :  { %v1626_v21 = vmul.f32 0.03125, %v1610_v23  ;;  %v1613_v1 = vpop.xlane.xlu0 %1612  ;;  %v1640_v57 = vmul.f32 %v3159_v20, %v3159_v20  ;;  %v1641_v36 = vmul.f32 %v3161_v52, %v3161_v52 }
 0x8e3   :  { %v1627_v55 = vmul.f32 0.03125, %v1613_v1  ;;  %v2168_v1 = vld [vmem:[%s3342_s7 + $0x12] ss:$0 sm:$0xff] }
 0x8e4   :  { %v3168_v13 = vsub.f32 %v1594_v62, %v1626_v21  ;;  %v1650_v37 = vsel %vm85_vm0, %v1640_v57, 0.0  ;;  %v1653_v11 = vsel %vm85_vm0, %v1641_v36, 0.0 }
 0x8e5   :  { %v3172_v59 = vsub.f32 %v1595_v41, %v1627_v55  ;;  %1651 = vadd.xlane.f32.xlu1 %v1650_v37  ;;  %1654 = vadd.xlane.f32.xlu0 %v1653_v11 }
 0x8e6   :  { %v1616_v63 = vpop.xlane.xlu1 %1615  ;;  %v1619_v7 = vpop.xlane.xlu0 %1618  ;;  %v1642_v48 = vmul.f32 %v3168_v13, %v3168_v13 }
 0x8e7   :  { %v1628_v39 = vmul.f32 0.03125, %v1616_v63  ;;  %v1629_v27 = vmul.f32 0.03125, %v1619_v7  ;;  %v1643_v25 = vmul.f32 %v3172_v59, %v3172_v59 }
 0x8e8   :  { %v1656_v24 = vsel %vm85_vm0, %v1642_v48, 0.0 }
 0x8e9   :  { %v3179_v44 = vsub.f32 %v1596_v51, %v1628_v39  ;;  %v3181_v47 = vsub.f32 %v1597_v56, %v1629_v27  ;;  %1657 = vadd.xlane.f32.xlu1 %v1656_v24  ;;  %v1659_v50 = vsel %vm85_vm0, %v1643_v25, 0.0 }
 0x8ea   :  { %v1622_v28 = vpop.xlane.xlu1 %1621  ;;  %1660 = vadd.xlane.f32.xlu0 %v1659_v50 }
 0x8eb   :  { %v1630_v54 = vmul.f32 0.03125, %v1622_v28  ;;  %v1644_v26 = vmul.f32 %v3179_v44, %v3179_v44  ;;  %v1645_v35 = vmul.f32 %v3181_v47, %v3181_v47 }
 0x8ed   :  { %v3188_v2 = vsub.f32 %v1598_v18, %v1630_v54  ;;  %v1662_v31 = vsel %vm85_vm0, %v1644_v26, 0.0  ;;  %v1665_v33 = vsel %vm85_vm0, %v1645_v35, 0.0 }
 0x8ee   :  { %1663 = vadd.xlane.f32.xlu1 %v1662_v31  ;;  %1666 = vadd.xlane.f32.xlu0 %v1665_v33 }
 0x8ef   :  { %v1646_v42 = vmul.f32 %v3188_v2, %v3188_v2 }
 0x8f1   :  { %v1668_v45 = vsel %vm85_vm0, %v1646_v42, 0.0 }
 0x8f2   :  { %1669 = vadd.xlane.f32.xlu1 %v1668_v45 }
 0x96a   :  { %v1649_v40 = vpop.xlane.xlu0 %1648 }
 0x96b   :  { %v1671_v34 = vmul.f32 0.03125, %v1649_v40 }
 0x96d   :  { %v1679_v60 = vadd.f32 1e-12, %v1671_v34 }
 0x96e   :  { %v1652_v12 = vpop.xlane.xlu1 %1651  ;;  %v1655_v49 = vpop.xlane.xlu0 %1654 }
 0x96f   :  { %2424 = vrsqrt.f32 %v1679_v60  ;;  %v1672_v14 = vmul.f32 0.03125, %v1652_v12  ;;  %v1673_v62 = vmul.f32 0.03125, %v1655_v49 }
 0x971   :  { %v1680_v10 = vadd.f32 1e-12, %v1672_v14  ;;  %v1681_v4 = vadd.f32 1e-12, %v1673_v62 }
 0x972   :  { %v1658_v29 = vpop.xlane.xlu1 %1657 }
 0x973   :  { %2426 = vrsqrt.f32 %v1680_v10  ;;  %v1674_v41 = vmul.f32 0.03125, %v1658_v29  ;;  %v1661_v15 = vpop.xlane.xlu0 %1660 }
 0x974   :  { %2428 = vrsqrt.f32 %v1681_v4  ;;  %v1675_v19 = vmul.f32 0.03125, %v1661_v15 }
 0x975   :  { %v1682_v38 = vadd.f32 1e-12, %v1674_v41 }
 0x976   :  { %v1683_v53 = vadd.f32 1e-12, %v1675_v19 }
 0x977   :  { %2430 = vrsqrt.f32 %v1682_v38  ;;  %v1664_v22 = vpop.xlane.xlu1 %1663  ;;  %v1667_v56 = vpop.xlane.xlu0 %1666  ;;  %v2176_v38 = vld [vmem:[%s3342_s7 + $0x15] ss:$0 sm:$0xff] }
 0x978   :  { %2432 = vrsqrt.f32 %v1683_v53  ;;  %v1676_v51 = vmul.f32 0.03125, %v1664_v22  ;;  %v1677_v8 = vmul.f32 0.03125, %v1667_v56 }
 0x97a   :  { %v1684_v30 = vadd.f32 1e-12, %v1676_v51  ;;  %v1685_v18 = vadd.f32 1e-12, %v1677_v8 }
 0x97b   :  { %v1670_v0 = vpop.xlane.xlu1 %1669 }
 0x97c   :  { %v2425_v3 = vpop.eup %2424  ;;  %2434 = vrsqrt.f32 %v1684_v30  ;;  %v1678_v17 = vmul.f32 0.03125, %v1670_v0 }
 0x97d   :  { %2436 = vrsqrt.f32 %v1685_v18  ;;  %v1695_v32 = vmul.f32 %v2425_v3, %v3155_v9 }
 0x97e   :  { %v1686_v16 = vadd.f32 1e-12, %v1678_v17 }
 0x97f   :  { %v1707_v23 = vmul.f32 %v2167_v61, %v1695_v32 }
 0x980   :  { %v2427_v43 = vpop.eup %2426  ;;  %2438 = vrsqrt.f32 %v1686_v16 }
 0x981   :  { %v2429_v46 = vpop.eup %2428  ;;  %v1696_v5 = vmul.f32 %v2427_v43, %v3159_v20  ;;  %v3211_v11 = vadd.f32 %v2168_v1, %v1707_v23 }
 0x982   :  { %v1697_v21 = vmul.f32 %v2429_v46, %v3161_v52 }
 0x983   :  { %v1708_v57 = vmul.f32 %v2167_v61, %v1696_v5 }
 0x984   :  { %v2431_v36 = vpop.eup %2430  ;;  %v1709_v55 = vmul.f32 %v2167_v61, %v1697_v21 }
 0x985   :  { %v2433_v9 = vpop.eup %2432  ;;  %v1698_v37 = vmul.f32 %v2431_v36, %v3168_v13  ;;  %v3213_v63 = vadd.f32 %v2168_v1, %v1708_v57 }
 0x986   :  { %v1699_v7 = vmul.f32 %v2433_v9, %v3172_v59  ;;  %v3219_v39 = vadd.f32 %v2168_v1, %v1709_v55 }
 0x987   :  { %v1710_v20 = vmul.f32 %v2167_v61, %v1698_v37  ;;  %v1731_v52 = vpack.c.bf16 %v3213_v63, %v3211_v11 }
 0x988   :  { %v1711_v24 = vmul.f32 %v2167_v61, %v1699_v7 }
 0x989   :  { %v2435_v48 = vpop.eup %2434  ;;  %2284 = vmatprep.mubr.msk.bf16.mxu1 %vm85_vm0, %v1731_v52  ;;  %v3221_v27 = vadd.f32 %v2168_v1, %v1710_v20  ;;  %v2177_v52 = vld [vmem:[%s3342_s7 + $0x14] ss:$0 sm:$0xff] }
 0x98a   :  { %v2437_v25 = vpop.eup %2436  ;;  %v1700_v13 = vmul.f32 %v2435_v48, %v3179_v44  ;;  %v3228_v26 = vadd.f32 %v2168_v1, %v1711_v24 }
 0x98b   :  { %v1732_v50 = vpack.c.bf16 %v3221_v27, %v3219_v39  ;;  %v1701_v59 = vmul.f32 %v2437_v25, %v3181_v47 }
 0x98c   :  { %v1712_v28 = vmul.f32 %v2167_v61, %v1700_v13 }
 0x98d   :  { %v2439_v54 = vpop.eup %2438  ;;  %2285 = vmatmul.mubr.msk.bf16.vlgmr.msra.gmra.mxu1 %vm85_vm0, %v1732_v50  ;;  %v1713_v33 = vmul.f32 %v2167_v61, %v1701_v59 }
 0x98e   :  { %v3230_v35 = vadd.f32 %v2168_v1, %v1712_v28  ;;  %v1702_v31 = vmul.f32 %v2439_v54, %v3188_v2  ;;  %v2169_v2 = vld [vmem:[%s3342_s7 + $0x13] ss:$0 sm:$0xff] }
 0x98f   :  { %v3236_v45 = vadd.f32 %v2168_v1, %v1713_v33 }
 0x990   :  { %v1733_v44 = vpack.c.bf16 %v3230_v35, %v3228_v26  ;;  %v1714_v42 = vmul.f32 %v2167_v61, %v1702_v31 }
 0x992   :  { %2288 = vmatprep.mubr.msk.bf16.mxu1 %vm85_vm0, %v1733_v44  ;;  %v3238_v47 = vadd.f32 %v2168_v1, %v1714_v42 }
 0x994   :  { %v1734_v6 = vpack.c.bf16 %v3238_v47, %v3236_v45 }
 0x996   :  { %2289 = vmatmul.mubr.msk.bf16.gmra.mxu1 %vm85_vm0, %v1734_v6 }
 0xa4d   :  { %v2286_v58 = vpop.f32.mrf.mxu1 }
 0xa4e   :  { %v1806_v40 = vadd.f32 %v2286_v58, %v2169_v2 }
 0xa4f   :  { %v1797_v34 = vpop.f32.mrf.mxu1 }
 0xa50   :  { %2440 = vtanh.f32 %v1806_v40  ;;  %v1798_v60 = vadd.f32 %v2169_v2, %v1797_v34 }
 0xa51   :  { %v2287_v12 = vpop.f32.mrf.mxu1 }
 0xa52   :  { %2442 = vtanh.f32 %v1798_v60  ;;  %v1809_v49 = vadd.f32 %v2287_v12, %v2169_v2 }
 0xa53   :  { %v1800_v14 = vpop.f32.mrf.mxu1 }
 0xa54   :  { %2444 = vtanh.f32 %v1809_v49  ;;  %v1801_v62 = vadd.f32 %v2169_v2, %v1800_v14 }
 0xa56   :  { %2446 = vtanh.f32 %v1801_v62  ;;  %v2290_v10 = vpop.f32.mrf.mxu1 }
 0xa57   :  { %v1822_v4 = vadd.f32 %v2290_v10, %v2169_v2 }
 0xa58   :  { %v1813_v29 = vpop.f32.mrf.mxu1 }
 0xa59   :  { %v1814_v41 = vadd.f32 %v2169_v2, %v1813_v29  ;;  %2448 = vtanh.f32 %v1822_v4  ;;  %v2488_v4 = vld [vmem:[%s3344_s1 + $0x10] sm:$0xff] }
 0xa5a   :  { %v2291_v15 = vpop.f32.mrf.mxu1 }
 0xa5b   :  { %2450 = vtanh.f32 %v1814_v41  ;;  %v1825_v19 = vadd.f32 %v2291_v15, %v2169_v2 }
 0xa5c   :  { %v1816_v53 = vpop.f32.mrf.mxu1 }
 0xa5d   :  { %v2441_v22 = vpop.eup %2440  ;;  %v1817_v56 = vadd.f32 %v2169_v2, %v1816_v53  ;;  %2452 = vtanh.f32 %v1825_v19 }
 0xa5e   :  { %v1842_v51 = vmul.f32 %v2441_v22, %v2176_v38 }
 0xa5f   :  { %v2443_v8 = vpop.eup %2442  ;;  %2454 = vtanh.f32 %v1817_v56  ;;  %v2489_v56 = vld [vmem:[%s3344_s1 + $0x18] sm:$0xff] }
 0xa60   :  { %v1855_v30 = vsel %vm1848_vm3, %v1842_v51, 0.0  ;;  %v1840_v18 = vmul.f32 %v2443_v8, %v2176_v38 }
 0xa61   :  { %v2445_v0 = vpop.eup %2444  ;;  %1856 = vadd.xlane.f32.xlu0 %v1855_v30  ;;  %v2490_v30 = vld [vmem:[%s3344_s1] sm:$0xff] }
 0xa62   :  { %v1843_v3 = vmul.f32 %v2445_v0, %v2176_v38  ;;  %v1849_v61 = vsel %vm1848_vm3, %v1840_v18, 0.0 }
 0xa63   :  { %v2447_v17 = vpop.eup %2446 }
 0xa64   :  { %v1858_v32 = vsel %vm1848_vm3, %v1843_v3, 0.0  ;;  %v1841_v16 = vmul.f32 %v2447_v17, %v2176_v38 }
 0xa65   :  { %1859 = vadd.xlane.f32.xlu1 %v1858_v32  ;;  %1850 = vadd.xlane.f32.xlu0 %v1849_v61 }
 0xa66   :  { %v2449_v43 = vpop.eup %2448  ;;  %v1852_v5 = vsel %vm1848_vm3, %v1841_v16, 0.0 }
 0xa67   :  { %v1846_v57 = vmul.f32 %v2449_v43, %v2176_v38  ;;  %v2491_v43 = vld [vmem:[%s3344_s1 + $0x8] sm:$0xff] }
 0xa68   :  { %v2451_v46 = vpop.eup %2450 }
 0xa69   :  { %1853 = vadd.xlane.f32.xlu1 %v1852_v5  ;;  %v1844_v23 = vmul.f32 %v2451_v46, %v2176_v38  ;;  %v1867_v37 = vsel %vm1848_vm3, %v1846_v57, 0.0 }
 0xa6a   :  { %v2453_v21 = vpop.eup %2452 }
 0xa6b   :  { %v1861_v1 = vsel %vm1848_vm3, %v1844_v23, 0.0  ;;  %v1847_v7 = vmul.f32 %v2453_v21, %v2176_v38 }
 0xa6c   :  { %v2455_v36 = vpop.eup %2454  ;;  %1862 = vadd.xlane.f32.xlu0 %v1861_v1 }
 0xa6d   :  { %v1845_v9 = vmul.f32 %v2455_v36, %v2176_v38  ;;  %v1870_v20 = vsel %vm1848_vm3, %v1847_v7, 0.0 }
 0xa6f   :  { %v1864_v55 = vsel %vm1848_vm3, %v1845_v9, 0.0 }
 0xa70   :  { %1865 = vadd.xlane.f32.xlu1 %v1864_v55  ;;  %1868 = vadd.xlane.f32.xlu0 %v1867_v37  ;;  %v2492_v37 = vld [vmem:[%s3344_s1 + $0x20] sm:$0xff] }
 0xa74   :  { %1871 = vadd.xlane.f32.xlu1 %v1870_v20 }
 0xaea   :  { %v1857_v48 = vpop.xlane.xlu0 %1856 }
 0xaeb   :  { %v1879_v25 = vadd.f32 %v2177_v52, %v1857_v48 }
 0xaed   :  { %v1889_v13 = vmul.f32 1.442695, %v1879_v25 }
 0xaee   :  { %v1860_v24 = vpop.xlane.xlu1 %1859  ;;  %v1851_v50 = vpop.xlane.xlu0 %1850 }
 0xaef   :  { %2456 = vpow2.f32 %v1889_v13  ;;  %v1880_v59 = vadd.f32 %v2177_v52, %v1860_v24  ;;  %v1877_v28 = vadd.f32 %v2177_v52, %v1851_v50 }
 0xaf1   :  { %v1891_v54 = vmul.f32 1.442695, %v1880_v59  ;;  %v1885_v31 = vmul.f32 1.442695, %v1877_v28 }
 0xaf2   :  { %v1854_v33 = vpop.xlane.xlu1 %1853 }
 0xaf3   :  { %2458 = vpow2.f32 %v1891_v54  ;;  %v1878_v44 = vadd.f32 %v2177_v52, %v1854_v33 }
 0xaf4   :  { %2460 = vpow2.f32 %v1885_v31 }
 0xaf5   :  { %v1887_v42 = vmul.f32 1.442695, %v1878_v44  ;;  %v1863_v6 = vpop.xlane.xlu0 %1862  ;;  %v2493_v44 = vld [vmem:[%s3344_s1 + $0x28] sm:$0xff] }
 0xaf6   :  { %v1881_v2 = vadd.f32 %v2177_v52, %v1863_v6 }
 0xaf7   :  { %2462 = vpow2.f32 %v1887_v42 }
 0xaf8   :  { %v1893_v58 = vmul.f32 1.442695, %v1881_v2 }
 0xaf9   :  { %v1866_v40 = vpop.xlane.xlu1 %1865  ;;  %v1869_v34 = vpop.xlane.xlu0 %1868 }
 0xafa   :  { %2464 = vpow2.f32 %v1893_v58  ;;  %v1882_v60 = vadd.f32 %v2177_v52, %v1866_v40  ;;  %v1883_v12 = vadd.f32 %v2177_v52, %v1869_v34  ;;  %v2494_v58 = vld [vmem:[%s3344_s1 + $0x30] sm:$0xff] }
 0xafc   :  { %v2457_v49 = vpop.eup %2456  ;;  %v1895_v14 = vmul.f32 1.442695, %v1882_v60  ;;  %v1897_v62 = vmul.f32 1.442695, %v1883_v12 }
 0xafd   :  { %v1872_v10 = vpop.xlane.xlu1 %1871  ;;  %v3263_v29 = vmul.f32 %v2488_v4, %v2457_v49 }
 0xafe   :  { %2466 = vpow2.f32 %v1895_v14  ;;  %v1884_v41 = vadd.f32 %v2177_v52, %v1872_v10 }
 0xaff   :  { %2468 = vpow2.f32 %v1897_v62  ;;  %v1924_v15 = vsel %vm1909_vm4, %v3263_v29, 0.0 }
 0xb00   :  { %v2459_v19 = vpop.eup %2458  ;;  %v1899_v38 = vmul.f32 1.442695, %v1884_v41  ;;  %v1925_v53 = vrot.slane %v1924_v15, 4 }
 0xb01   :  { %v2461_v22 = vpop.eup %2460  ;;  %v3270_v51 = vmul.f32 %v2489_v56, %v2459_v19  ;;  %v2495_v19 = vld [vmem:[%s3344_s1 + $0x38] sm:$0xff] }
 0xb02   :  { %2470 = vpow2.f32 %v1899_v38  ;;  %v1926_v8 = vadd.f32 %v1925_v53, %v1924_v15  ;;  %v3275_v18 = vmul.f32 %v2490_v30, %v2461_v22 }
 0xb03   :  { %v1931_v0 = vsel %vm1909_vm4, %v3270_v51, 0.0 }
 0xb04   :  { %v2463_v3 = vpop.eup %2462  ;;  %v1927_v17 = vrot.slane %v1926_v8, 2  ;;  %v1910_v32 = vsel %vm1909_vm4, %v3275_v18, 0.0  ;;  %v1932_v61 = vrot.slane %v1931_v0, 4 }
 0xb05   :  { %v1911_v16 = vrot.slane %v1910_v32, 4  ;;  %v3284_v46 = vmul.f32 %v2491_v43, %v2463_v3 }
 0xb06   :  { %v1928_v5 = vadd.f32 %v1927_v17, %v1926_v8  ;;  %v1933_v23 = vadd.f32 %v1932_v61, %v1931_v0 }
 0xb07   :  { %v2465_v21 = vpop.eup %2464  ;;  %v1912_v1 = vadd.f32 %v1911_v16, %v1910_v32  ;;  %v1917_v57 = vsel %vm1909_vm4, %v3284_v46, 0.0 }
 0xb08   :  { %v1929_v36 = vrot.slane %v1928_v5, 1  ;;  %v1918_v9 = vrot.slane %v1917_v57, 4  ;;  %v1934_v55 = vrot.slane %v1933_v23, 2  ;;  %v3291_v7 = vmul.f32 %v2492_v37, %v2465_v21 }
 0xb09   :  { %v1913_v20 = vrot.slane %v1912_v1, 2 }
 0xb0a   :  { %v1930_v52 = vadd.f32 %v1929_v36, %v1928_v5  ;;  %v1919_v48 = vadd.f32 %v1918_v9, %v1917_v57  ;;  %v1935_v25 = vadd.f32 %v1934_v55, %v1933_v23  ;;  %v1938_v13 = vsel %vm1909_vm4, %v3291_v7, 0.0 }
 0xb0b   :  { %v2467_v24 = vpop.eup %2466  ;;  %v1914_v50 = vadd.f32 %v1913_v20, %v1912_v1  ;;  %v1939_v59 = vrot.slane %v1938_v13, 4 }
 0xb0c   :  { %v2469_v28 = vpop.eup %2468  ;;  %v1968_v54 = vadd.f32 1e-08, %v1930_v52  ;;  %v1920_v31 = vrot.slane %v1919_v48, 2  ;;  %v1936_v33 = vrot.slane %v1935_v25, 1  ;;  %v3298_v42 = vmul.f32 %v2493_v44, %v2467_v24 }
 0xb0d   :  { %v1915_v6 = vrot.slane %v1914_v50, 1  ;;  %v1940_v2 = vadd.f32 %v1939_v59, %v1938_v13  ;;  %v3303_v40 = vmul.f32 %v2494_v58, %v2469_v28 }
 0xb0e   :  { %2472 = vrcp.f32 %v1968_v54  ;;  %v1921_v34 = vadd.f32 %v1920_v31, %v1919_v48  ;;  %v1937_v60 = vadd.f32 %v1936_v33, %v1935_v25  ;;  %v1945_v12 = vsel %vm1909_vm4, %v3298_v42, 0.0 }
 0xb0f   :  { %v2471_v49 = vpop.eup %2470  ;;  %v1916_v14 = vadd.f32 %v1915_v6, %v1914_v50  ;;  %v1941_v62 = vrot.slane %v1940_v2, 2  ;;  %v1946_v10 = vrot.slane %v1945_v12, 4  ;;  %v1952_v4 = vsel %vm1909_vm4, %v3303_v40, 0.0 }
 0xb10   :  { %v1922_v41 = vrot.slane %v1921_v34, 1  ;;  %v1953_v15 = vrot.slane %v1952_v4, 4  ;;  %v1908_v38 = vmul.f32 %v2495_v19, %v2471_v49  ;;  %v1969_v22 = vadd.f32 1e-08, %v1937_v60 }
 0xb11   :  { %v1966_v53 = vadd.f32 1e-08, %v1916_v14  ;;  %v1942_v56 = vadd.f32 %v1941_v62, %v1940_v2  ;;  %v1947_v8 = vadd.f32 %v1946_v10, %v1945_v12 }
 0xb12   :  { %v1923_v30 = vadd.f32 %v1922_v41, %v1921_v34  ;;  %v1954_v0 = vadd.f32 %v1953_v15, %v1952_v4  ;;  %v1959_v3 = vsel %vm1909_vm4, %v1908_v38, 0.0 }
 0xb13   :  { %2474 = vrcp.f32 %v1966_v53  ;;  %v1943_v17 = vrot.slane %v1942_v56, 1  ;;  %v1948_v32 = vrot.slane %v1947_v8, 2  ;;  %v1960_v61 = vrot.slane %v1959_v3, 4 }
 0xb14   :  { %v1967_v16 = vadd.f32 1e-08, %v1923_v30  ;;  %v1955_v43 = vrot.slane %v1954_v0, 2  ;;  %2476 = vrcp.f32 %v1969_v22 }
 0xb15   :  { %v1944_v5 = vadd.f32 %v1943_v17, %v1942_v56  ;;  %v1949_v23 = vadd.f32 %v1948_v32, %v1947_v8  ;;  %v1961_v21 = vadd.f32 %v1960_v61, %v1959_v3 }
 0xb16   :  { %2478 = vrcp.f32 %v1967_v16  ;;  %v1956_v1 = vadd.f32 %v1955_v43, %v1954_v0 }
 0xb17   :  { %v1970_v57 = vadd.f32 1e-08, %v1944_v5  ;;  %v1950_v36 = vrot.slane %v1949_v23, 1  ;;  %v1962_v9 = vrot.slane %v1961_v21, 2 }
 0xb18   :  { %v1957_v55 = vrot.slane %v1956_v1, 1 }
 0xb19   :  { %2480 = vrcp.f32 %v1970_v57  ;;  %v1951_v37 = vadd.f32 %v1950_v36, %v1949_v23  ;;  %v1963_v20 = vadd.f32 %v1962_v9, %v1961_v21 }
 0xb1a   :  { %v1958_v52 = vadd.f32 %v1957_v55, %v1956_v1 }
 0xb1b   :  { %v2473_v48 = vpop.eup %2472  ;;  %v1971_v25 = vadd.f32 1e-08, %v1951_v37  ;;  %v1964_v13 = vrot.slane %v1963_v20, 1 }
 0xb1c   :  { %v1984_v24 = vmul.f32 %v2473_v48, %v3263_v29  ;;  %v1972_v50 = vadd.f32 1e-08, %v1958_v52 }
 0xb1d   :  { %2482 = vrcp.f32 %v1971_v25  ;;  %v1965_v59 = vadd.f32 %v1964_v13, %v1963_v20 }
 0xb1e   :  { %2002 = vperm.xlu1 %2297, %v1984_v24   ;;  %2484 = vrcp.f32 %v1972_v50 }
 0xb1f   :  { %v1973_v28 = vadd.f32 1e-08, %v1965_v59 }
 0xb20   :  { %v2475_v54 = vpop.eup %2474 }
 0xb21   :  { %v1982_v31 = vmul.f32 %v2475_v54, %v3275_v18  ;;  %2486 = vrcp.f32 %v1973_v28  ;;  %v2477_v33 = vpop.eup %2476 }
 0xb22   :  { %v1985_v2 = vmul.f32 %v2477_v33, %v3270_v51 }
 0xb23   :  { %v2479_v44 = vpop.eup %2478  ;;  %1992 = vperm.xlu0 %2296, %v1982_v31  }
 0xb24   :  { %v1983_v6 = vmul.f32 %v2479_v44, %v3284_v46 }
 0xb26   :  { %v2481_v58 = vpop.eup %2480  ;;  %1997 = vperm.xlu1 %2297, %v1983_v6  }
 0xb27   :  { %2007 = vperm.xlu0 %2296, %v1985_v2   ;;  %v1986_v29 = vmul.f32 %v2481_v58, %v3291_v7 }
 0xb2a   :  { %v2483_v34 = vpop.eup %2482  ;;  %2012 = vperm.xlu1 %2297, %v1986_v29  }
 0xb2b   :  { %v2485_v60 = vpop.eup %2484  ;;  %v1987_v12 = vmul.f32 %v2483_v34, %v3298_v42 }
 0xb2c   :  { %v1988_v18 = vmul.f32 %v2485_v60, %v3303_v40 }
 0xb2d   :  { %2017 = vperm.xlu0 %2296, %v1987_v12  }
 0xb2e   :  { %v2487_v49 = vpop.eup %2486  ;;  %2022 = vperm.xlu1 %2297, %v1988_v18  }
 0xb2f   :  { %v1989_v14 = vmul.f32 %v2487_v49, %v1908_v38 }
 0xb31   :  { %2027 = vperm.xlu0 %2296, %v1989_v14  }
 0xb99   :  { %v2003_v46 = vpop.permute.xlu1 %2002 }
 0xb9a   :  { %v2032_v51 = vmul.f32 %v2003_v46, %v3219_v39 }
 0xb9c   :  { %v2052_v62 = vsel %vm85_vm0, %v2032_v51, 0.0 }
 0xb9d   :  { %v2053_v10 = vrot.slane %v2052_v62, 4 }
 0xb9e   :  { %v1993_v4 = vpop.permute.xlu0 %1992 }
 0xb9f   :  { %v2030_v7 = vmul.f32 %v1993_v4, %v3211_v11  ;;  %v2054_v41 = vadd.f32 %v2053_v10, %v2052_v62 }
 0xba1   :  { %v2038_v15 = vsel %vm85_vm0, %v2030_v7, 0.0  ;;  %v1998_v42 = vpop.permute.xlu1 %1997  ;;  %v2055_v22 = vrot.slane %v2054_v41, 2 }
 0xba2   :  { %v2039_v19 = vrot.slane %v2038_v15, 4  ;;  %v2031_v40 = vmul.f32 %v1998_v42, %v3213_v63  ;;  %v2008_v53 = vpop.permute.xlu0 %2007 }
 0xba3   :  { %v2033_v38 = vmul.f32 %v2008_v53, %v3221_v27  ;;  %v2056_v61 = vadd.f32 %v2055_v22, %v2054_v41 }
 0xba4   :  { %v2040_v56 = vadd.f32 %v2039_v19, %v2038_v15  ;;  %v2045_v39 = vsel %vm85_vm0, %v2031_v40, 0.0 }
 0xba5   :  { %v2046_v8 = vrot.slane %v2045_v39, 4  ;;  %v2059_v30 = vsel %vm85_vm0, %v2033_v38, 0.0  ;;  %v2013_v0 = vpop.permute.xlu1 %2012  ;;  %v2057_v20 = vrot.slane %v2056_v61, 1 }
 0xba6   :  { %v2041_v3 = vrot.slane %v2040_v56, 2  ;;  %v2060_v11 = vrot.slane %v2059_v30, 4  ;;  %v2034_v17 = vmul.f32 %v2013_v0, %v3228_v26 }
 0xba7   :  { %v2047_v32 = vadd.f32 %v2046_v8, %v2045_v39  ;;  %v2058_v2 = vadd.f32 %v2057_v20, %v2056_v61 }
 0xba8   :  { %v2042_v16 = vadd.f32 %v2041_v3, %v2040_v56  ;;  %v2061_v43 = vadd.f32 %v2060_v11, %v2059_v30  ;;  %v2066_v63 = vsel %vm85_vm0, %v2034_v17, 0.0  ;;  %v2018_v5 = vpop.permute.xlu0 %2017 }
 0xba9   :  { %v2048_v27 = vrot.slane %v2047_v32, 2  ;;  %v2067_v23 = vrot.slane %v2066_v63, 4  ;;  %v2035_v21 = vmul.f32 %v2018_v5, %v3230_v35  ;;  %v2023_v1 = vpop.permute.xlu1 %2022 }
 0xbaa   :  { %v2043_v57 = vrot.slane %v2042_v16, 1  ;;  %v2062_v36 = vrot.slane %v2061_v43, 2  ;;  %v2036_v9 = vmul.f32 %v2023_v1, %v3236_v45 }
 0xbab   :  { %v2049_v55 = vadd.f32 %v2048_v27, %v2047_v32  ;;  %v2068_v37 = vadd.f32 %v2067_v23, %v2066_v63  ;;  %v2073_v26 = vsel %vm85_vm0, %v2035_v21, 0.0 }
 0xbac   :  { %v2063_v52 = vadd.f32 %v2062_v36, %v2061_v43  ;;  %v2074_v48 = vrot.slane %v2073_v26, 4  ;;  %v2080_v25 = vsel %vm85_vm0, %v2036_v9, 0.0  ;;  %v2028_v13 = vpop.permute.xlu0 %2027  ;;  %v2044_v28 = vadd.f32 %v2043_v57, %v2042_v16 }
 0xbad   :  { %v2050_v24 = vrot.slane %v2049_v55, 1  ;;  %v2069_v50 = vrot.slane %v2068_v37, 2  ;;  %v2081_v59 = vrot.slane %v2080_v25, 4  ;;  %v2037_v35 = vmul.f32 %v2028_v13, %v3238_v47 }
 0xbae   :  { %v2064_v54 = vrot.slane %v2063_v52, 1  ;;  %v2075_v45 = vadd.f32 %v2074_v48, %v2073_v26 }
 0xbaf   :  { %v2051_v31 = vadd.f32 %v2050_v24, %v2049_v55  ;;  %v2070_v33 = vadd.f32 %v2069_v50, %v2068_v37  ;;  %v2082_v44 = vadd.f32 %v2081_v59, %v2080_v25  ;;  %v2087_v6 = vsel %vm85_vm0, %v2037_v35, 0.0 }
 0xbb0   :  { %v2076_v58 = vrot.slane %v2075_v45, 2  ;;  %v2088_v29 = vrot.slane %v2087_v6, 4  ;;  %v2065_v60 = vadd.f32 %v2064_v54, %v2063_v52 }
 0xbb1   :  { %v2103_v34 = vsel %vm2102_vm5, %v2051_v31, %v2044_v28  ;;  %v2071_v12 = vrot.slane %v2070_v33, 1  ;;  %v2083_v18 = vrot.slane %v2082_v44, 2 }
 0xbb2   :  { %v2105_v49 = vsel %vm2104_vm6, %v2058_v2, %v2103_v34  ;;  %v2077_v47 = vadd.f32 %v2076_v58, %v2075_v45  ;;  %v2089_v14 = vadd.f32 %v2088_v29, %v2087_v6 }
 0xbb3   :  { %v2107_v46 = vsel %vm2106_vm7, %v2065_v60, %v2105_v49  ;;  %v2072_v51 = vadd.f32 %v2071_v12, %v2070_v33  ;;  %v2084_v62 = vadd.f32 %v2083_v18, %v2082_v44 }
 0xbb4   :  { %v2078_v10 = vrot.slane %v2077_v47, 1  ;;  %v2090_v4 = vrot.slane %v2089_v14, 2 }
 0xbb5   :  { %v2109_v7 = vsel %vm2108_vm8, %v2072_v51, %v2107_v46  ;;  %v2085_v41 = vrot.slane %v2084_v62, 1 }
 0xbb6   :  { %v2079_v15 = vadd.f32 %v2078_v10, %v2077_v47  ;;  %v2091_v42 = vadd.f32 %v2090_v4, %v2089_v14 }
 0xbb7   :  { %v2086_v19 = vadd.f32 %v2085_v41, %v2084_v62 }
 0xbb8   :  { %v2111_v40 = vsel %vm2110_vm9, %v2079_v15, %v2109_v7  ;;  %v2092_v53 = vrot.slane %v2091_v42, 1 }
 0xbb9   :  { %v2113_v38 = vsel %vm2112_vm10, %v2086_v19, %v2111_v40 }
 0xbba   :  { %v2093_v22 = vadd.f32 %v2092_v53, %v2091_v42 }
 0xbbc   :  { %v2115_v56 = vsel %vm2114_vm11, %v2093_v22, %v2113_v38 }
 0xbbd   :  { %2117 = vst.msk [vmem:[%s3349_s8] sm:$0xff] %vm85_vm0, %v2115_v56 }

</bundles_post_ra>
